<compile_context>
chip_gen: v6e
topology: v6e:2x2x1
jax: 0.10.0
libtpu: 0.0.40
codegen_flags: <defaults>
</compile_context>

<pallas_src>
import jax
import jax.numpy as jnp
import numpy as np
from jax.experimental import pallas as pl
from jax.experimental.pallas import tpu as pltpu


_LANE_PAD = 128  # lane-tile-aligned zero pad for flattened-spatial shifts


# ----------------------------------------------------------------------------
# Fused dense-block kernel factory.
#   Internal activation layout: (channels, H*W)  -- pixels on lanes.
#   refs = (x, masks, [w1t, b1, w3t, b3] * layers, wft, bf, out)
# ----------------------------------------------------------------------------
def _make_dense_block_kernel(in_ch, growth, layers, H, W):
    HW = H * W

    def kernel(*refs):
        x_ref = refs[0]
        mask_ref = refs[1]
        o_ref = refs[-1]
        wrefs = refs[2:-1]

        masks = mask_ref[...]                 # (2, HW) f32 {0,1}
        not_left = masks[0:1, :]              # zero where pixel col == 0
        not_right = masks[1:2, :]             # zero where pixel col == W-1

        # feats is kept as a list of channel chunks resident on-chip
        # (chunk 0 = input channels, chunk k = layer k-1 output channels).
        chunks = [x_ref[0]]                   # (in_ch, HW), raw input
        widths = [in_ch]

        for i in range(layers):
            c_i = in_ch + i * growth
            w1t_ref, b1_ref, w3t_ref, b3_ref = wrefs[4 * i: 4 * i + 4]

            # ---- 1x1 conv + ReLU:  y = relu(W1^T @ feats + b1) -------------
            # concat(feats) @ W1 == sum over chunks of chunk @ W1[rows of chunk]
            w1t = w1t_ref[...]                # (c_i, c_i), cols = input chan
            acc = jnp.zeros((c_i, HW), jnp.float32)
            off = 0
            for ch, wdt in zip(chunks, widths):
                acc = acc + jnp.dot(w1t[:, off:off + wdt], ch,
                                    preferred_element_type=jnp.float32)
                off += wdt
            y = jnp.maximum(acc + b1_ref[...], 0.0)          # (c_i, HW)

            # ---- 3x3 conv, padding=1 (flattened-spatial shifted taps) -------
            zpad = jnp.zeros((c_i, _LANE_PAD), jnp.float32)
            ypad = jnp.concatenate([zpad, y, zpad], axis=1)  # lane-aligned pad
            w3t = w3t_ref[...]                               # (9, growth, c_i)
            per_dx = []
            for dx in range(3):
                a = jnp.zeros((growth, HW), jnp.float32)
                for dy in range(3):
                    s = (dy - 1) * W + (dx - 1)
                    patch = ypad[:, _LANE_PAD + s:_LANE_PAD + s + HW]
                    a = a + jnp.dot(w3t[3 * dy + dx], patch,
                                    preferred_element_type=jnp.float32)
                per_dx.append(a)
            # left/right taps that wrapped across a row boundary are masked out
            conv3 = per_dx[1] + not_left * per_dx[0] + not_right * per_dx[2]
            new_chunk = jnp.maximum(conv3 + b3_ref[...], 0.0)  # fused ReLU

            if i == 0:
                # post-concat ReLU only matters for the raw input channels
                # (all other chunks are already non-negative).
                chunks[0] = jnp.maximum(chunks[0], 0.0)
            chunks.append(new_chunk)
            widths.append(growth)

        # ---- final 1x1 conv + ReLU ------------------------------------------
        wft = wrefs[4 * layers][...]          # (in_ch, C_tot) = Wf^T
        bf = wrefs[4 * layers + 1][...]       # (in_ch, 1)
        acc = jnp.zeros((in_ch, HW), jnp.float32)
        off = 0
        for ch, wdt in zip(chunks, widths):
            acc = acc + jnp.dot(wft[:, off:off + wdt], ch,
                                preferred_element_type=jnp.float32)
            off += wdt
        out = jnp.maximum(acc + bf, 0.0)      # (in_ch, HW), lanes dense
        o_ref[...] = out.reshape(1, in_ch, HW).astype(o_ref.dtype)

    return kernel


# ----------------------------------------------------------------------------
# Wrapper: NCHW in/out, one fused pallas_call per forward pass.
# ----------------------------------------------------------------------------
@jax.jit
def dense_block_forward_nchw(x_nchw, params):
    N, in_ch, H, W = x_nchw.shape
    HW = H * W
    layers = len(params["layers"])
    growth = params["layers"][0][2].shape[-1] if layers else 0
    c_tot = in_ch + layers * growth

    # NCHW -> (N, C, H*W): free reshape, keeps pixels on the lane axis.
    x_flat = x_nchw.reshape(N, in_ch, HW)

    # Column-boundary masks for the 3x3 conv taps (computed once, tiny).
    col = jnp.arange(HW) % W
    masks = jnp.stack([(col != 0).astype(x_nchw.dtype),
                       (col != (W - 1)).astype(x_nchw.dtype)], axis=0)  # (2,HW)

    inputs = [x_flat, masks]
    in_specs = [
        pl.BlockSpec((1, in_ch, HW), lambda n: (n, 0, 0)),
        pl.BlockSpec((2, HW), lambda n: (0, 0)),
    ]
    for (w1, b1, w3, b3) in params["layers"]:
        c_i = w1.shape[0]
        g = w3.shape[-1]
        w1t = w1.T                                                 # (Cout, Cin)
        b1c = b1.reshape(c_i, 1)
        w3t = jnp.transpose(w3, (0, 1, 3, 2)).reshape(9, g, c_i)   # (tap, O, I)
        b3c = b3.reshape(g, 1)
        inputs += [w1t, b1c, w3t, b3c]
        in_specs += [
            pl.BlockSpec((c_i, c_i), lambda n: (0, 0)),
            pl.BlockSpec((c_i, 1), lambda n: (0, 0)),
            pl.BlockSpec((9, g, c_i), lambda n: (0, 0, 0)),
            pl.BlockSpec((g, 1), lambda n: (0, 0)),
        ]
    wf, bf = params["final"]
    inputs += [wf.T, bf.reshape(in_ch, 1)]
    in_specs += [
        pl.BlockSpec((in_ch, c_tot), lambda n: (0, 0)),
        pl.BlockSpec((in_ch, 1), lambda n: (0, 0)),
    ]

    kernel = _make_dense_block_kernel(in_ch, growth, layers, H, W)
    out_flat = pl.pallas_call(
        kernel,
        out_shape=jax.ShapeDtypeStruct((N, in_ch, HW), x_nchw.dtype),
        grid_spec=pltpu.PrefetchScalarGridSpec(
            num_scalar_prefetch=0,
            grid=(N,),                       # one image per grid step
            in_specs=in_specs,
            out_specs=pl.BlockSpec((1, in_ch, HW), lambda n: (n, 0, 0)),
        ),
        compiler_params=pltpu.CompilerParams(
            dimension_semantics=("parallel",),
        ),
    )(*inputs)
    return out_flat.reshape(N, in_ch, H, W)


# ----------------------------------------------------------------------------
# Parameter construction (JAX-side convention: 1x1 weights as (Cin, Cout),
# 3x3 weights as HWIO) and pure-JAX reference for correctness checking.
# ----------------------------------------------------------------------------
def init_dense_block_params(key, in_channels, growth_factor, layers):
    params = {"layers": [], "final": None}
    for i in range(layers):
        ci = in_channels + i * growth_factor
        key, k1, k2, k3, k4 = jax.random.split(key, 5)
        w1 = jax.random.normal(k1, (ci, ci), jnp.float32) * 0.1
        b1 = jax.random.normal(k2, (ci,), jnp.float32) * 0.1
        w3 = jax.random.normal(k3, (3, 3, ci, growth_factor), jnp.float32) * 0.1
        b3 = jax.random.normal(k4, (growth_factor,), jnp.float32) * 0.1
        params["layers"].append((w1, b1, w3, b3))
    c_tot = in_channels + layers * growth_factor
    key, k1, k2 = jax.random.split(key, 3)
    wf = jax.random.normal(k1, (c_tot, in_channels), jnp.float32) * 0.1
    bf = jax.random.normal(k2, (in_channels,), jnp.float32) * 0.1
    params["final"] = (wf, bf)
    return params


def _conv_ref(x, w_hwio, b, padding):
    y = jax.lax.conv_general_dilated(
        x, w_hwio, window_strides=(1, 1), padding=padding,
        dimension_numbers=("NHWC", "HWIO", "NHWC"))
    return y + b


def dense_block_ref_nchw(x_nchw, params):
    feats = jnp.transpose(x_nchw, (0, 2, 3, 1))
    for (w1, b1, w3, b3) in params["layers"]:
        y = jax.nn.relu(_conv_ref(feats, w1.reshape(1, 1, *w1.shape), b1, "VALID"))
        out = _conv_ref(y, w3, b3, "SAME")
        feats = jax.nn.relu(jnp.concatenate([feats, out], axis=-1))
    wf, bf = params["final"]
    out = jax.nn.relu(_conv_ref(feats, wf.reshape(1, 1, *wf.shape), bf, "VALID"))
    return jnp.transpose(out, (0, 3, 1, 2))


if __name__ == "__main__":
    in_channels, growth_factor, layers = 4, 4, 3
    N, H, W = 2, 16, 16

    key = jax.random.PRNGKey(0)
    key, kx = jax.random.split(key)
    x = jax.random.normal(kx, (N, in_channels, H, W), jnp.float32)  # NCHW

    params = init_dense_block_params(key, in_channels, growth_factor, layers)

    out = dense_block_forward_nchw(x, params)
    out = jax.block_until_ready(out)
    assert out.shape == (N, in_channels, H, W), out.shape

    ref = jax.block_until_ready(dense_block_ref_nchw(x, params))
    np.testing.assert_allclose(np.asarray(out), np.asarray(ref), rtol=1e-4, atol=1e-4)

    print("KERNEL_OK")
</pallas_src>

<mosaic_0001>
module attributes {stable_mosaic.version = 11 : i64} {
  func.func @kernel(%arg0: i32, %arg1: memref<1x4x256xf32, #tpu.memory_space<vmem>>, %arg2: memref<2x256xf32, #tpu.memory_space<vmem>>, %arg3: memref<4x4xf32, #tpu.memory_space<vmem>>, %arg4: memref<4x1xf32, #tpu.memory_space<vmem>>, %arg5: memref<9x4x4xf32, #tpu.memory_space<vmem>>, %arg6: memref<4x1xf32, #tpu.memory_space<vmem>>, %arg7: memref<8x8xf32, #tpu.memory_space<vmem>>, %arg8: memref<8x1xf32, #tpu.memory_space<vmem>>, %arg9: memref<9x4x8xf32, #tpu.memory_space<vmem>>, %arg10: memref<4x1xf32, #tpu.memory_space<vmem>>, %arg11: memref<12x12xf32, #tpu.memory_space<vmem>>, %arg12: memref<12x1xf32, #tpu.memory_space<vmem>>, %arg13: memref<9x4x12xf32, #tpu.memory_space<vmem>>, %arg14: memref<4x1xf32, #tpu.memory_space<vmem>>, %arg15: memref<4x16xf32, #tpu.memory_space<vmem>>, %arg16: memref<4x1xf32, #tpu.memory_space<vmem>>, %arg17: memref<1x4x256xf32, #tpu.memory_space<vmem>>) attributes {dimension_semantics = [#tpu.dimension_semantics<parallel>], iteration_bounds = array<i64: 2>, scalar_prefetch = 0 : i64, scratch_operands = 0 : i64, tpu.core_type = #tpu.core_type<tc>, window_params = [{transform_indices = @transform_0, window_bounds = array<i64: 1, 4, 256>}, {pipeline_mode = #tpu.pipeline_mode<synchronous>, transform_indices = @transform_1, window_bounds = array<i64: 2, 256>}, {pipeline_mode = #tpu.pipeline_mode<synchronous>, transform_indices = @transform_2, window_bounds = array<i64: 4, 4>}, {pipeline_mode = #tpu.pipeline_mode<synchronous>, transform_indices = @transform_3, window_bounds = array<i64: 4, 1>}, {pipeline_mode = #tpu.pipeline_mode<synchronous>, transform_indices = @transform_4, window_bounds = array<i64: 9, 4, 4>}, {pipeline_mode = #tpu.pipeline_mode<synchronous>, transform_indices = @transform_5, window_bounds = array<i64: 4, 1>}, {pipeline_mode = #tpu.pipeline_mode<synchronous>, transform_indices = @transform_6, window_bounds = array<i64: 8, 8>}, {pipeline_mode = #tpu.pipeline_mode<synchronous>, transform_indices = @transform_7, window_bounds = array<i64: 8, 1>}, {pipeline_mode = #tpu.pipeline_mode<synchronous>, transform_indices = @transform_8, window_bounds = array<i64: 9, 4, 8>}, {pipeline_mode = #tpu.pipeline_mode<synchronous>, transform_indices = @transform_9, window_bounds = array<i64: 4, 1>}, {pipeline_mode = #tpu.pipeline_mode<synchronous>, transform_indices = @transform_10, window_bounds = array<i64: 12, 12>}, {pipeline_mode = #tpu.pipeline_mode<synchronous>, transform_indices = @transform_11, window_bounds = array<i64: 12, 1>}, {pipeline_mode = #tpu.pipeline_mode<synchronous>, transform_indices = @transform_12, window_bounds = array<i64: 9, 4, 12>}, {pipeline_mode = #tpu.pipeline_mode<synchronous>, transform_indices = @transform_13, window_bounds = array<i64: 4, 1>}, {pipeline_mode = #tpu.pipeline_mode<synchronous>, transform_indices = @transform_14, window_bounds = array<i64: 4, 16>}, {pipeline_mode = #tpu.pipeline_mode<synchronous>, transform_indices = @transform_15, window_bounds = array<i64: 4, 1>}, {transform_indices = @transform_16, window_bounds = array<i64: 1, 4, 256>}]} {
    %c0 = arith.constant 0 : index
    %c0_0 = arith.constant 0 : index
    %0 = vector.load %arg2[%c0, %c0_0] : memref<2x256xf32, #tpu.memory_space<vmem>>, vector<2x256xf32>
    %1 = vector.extract_strided_slice %0 {offsets = [0, 0], sizes = [1, 256], strides = [1, 1]} : vector<2x256xf32> to vector<1x256xf32>
    %2 = vector.extract_strided_slice %0 {offsets = [1, 0], sizes = [1, 256], strides = [1, 1]} : vector<2x256xf32> to vector<1x256xf32>
    %c0_1 = arith.constant 0 : index
    %c0_2 = arith.constant 0 : index
    %c0_3 = arith.constant 0 : index
    %3 = vector.load %arg1[%c0_1, %c0_2, %c0_3] : memref<1x4x256xf32, #tpu.memory_space<vmem>>, vector<1x4x256xf32>
    %4 = vector.shape_cast %3 : vector<1x4x256xf32> to vector<4x256xf32>
    %c0_4 = arith.constant 0 : index
    %c0_5 = arith.constant 0 : index
    %5 = vector.load %arg3[%c0_4, %c0_5] : memref<4x4xf32, #tpu.memory_space<vmem>>, vector<4x4xf32>
    %cst = arith.constant 0.000000e+00 : f32
    %6 = vector.broadcast %cst : f32 to vector<4x256xf32>
    %cst_6 = arith.constant dense<0.000000e+00> : vector<4x256xf32>
    %7 = tpu.matmul %5, %4, %cst_6 {dimension_numbers = #tpu.dot_dimension_numbers<[1], [0], [0], [1], [0, 0, 1, 1], [], []>} : vector<4x4xf32>, vector<4x256xf32>, vector<4x256xf32> -> vector<4x256xf32>
    %8 = arith.addf %6, %7 : vector<4x256xf32>
    %c0_7 = arith.constant 0 : index
    %c0_8 = arith.constant 0 : index
    %9 = vector.load %arg4[%c0_7, %c0_8] : memref<4x1xf32, #tpu.memory_space<vmem>>, vector<4x1xf32>
    %10 = vector.broadcast %9 : vector<4x1xf32> to vector<4x256xf32>
    %11 = arith.addf %8, %10 : vector<4x256xf32>
    %cst_9 = arith.constant 0.000000e+00 : f32
    %12 = vector.broadcast %cst_9 : f32 to vector<4x256xf32>
    %13 = arith.maximumf %11, %12 : vector<4x256xf32>
    %cst_10 = arith.constant 0.000000e+00 : f32
    %14 = vector.broadcast %cst_10 : f32 to vector<4x128xf32>
    %15 = tpu.concatenate %14, %13, %14 in 1 : vector<4x128xf32>, vector<4x256xf32>, vector<4x128xf32> -> vector<4x512xf32>
    %c0_11 = arith.constant 0 : index
    %c0_12 = arith.constant 0 : index
    %c0_13 = arith.constant 0 : index
    %16 = vector.load %arg5[%c0_11, %c0_12, %c0_13] : memref<9x4x4xf32, #tpu.memory_space<vmem>>, vector<9x4x4xf32>
    %cst_14 = arith.constant 0.000000e+00 : f32
    %17 = vector.broadcast %cst_14 : f32 to vector<4x256xf32>
    %18 = vector.extract_strided_slice %15 {offsets = [0, 111], sizes = [4, 256], strides = [1, 1]} : vector<4x512xf32> to vector<4x256xf32>
    %19 = vector.extract_strided_slice %16 {offsets = [0, 0, 0], sizes = [1, 4, 4], strides = [1, 1, 1]} : vector<9x4x4xf32> to vector<1x4x4xf32>
    %20 = vector.shape_cast %19 : vector<1x4x4xf32> to vector<4x4xf32>
    %cst_15 = arith.constant dense<0.000000e+00> : vector<4x256xf32>
    %21 = tpu.matmul %20, %18, %cst_15 {dimension_numbers = #tpu.dot_dimension_numbers<[1], [0], [0], [1], [0, 0, 1, 1], [], []>} : vector<4x4xf32>, vector<4x256xf32>, vector<4x256xf32> -> vector<4x256xf32>
    %22 = arith.addf %17, %21 : vector<4x256xf32>
    %23 = vector.extract_strided_slice %15 {offsets = [0, 127], sizes = [4, 256], strides = [1, 1]} : vector<4x512xf32> to vector<4x256xf32>
    %24 = vector.extract_strided_slice %16 {offsets = [3, 0, 0], sizes = [1, 4, 4], strides = [1, 1, 1]} : vector<9x4x4xf32> to vector<1x4x4xf32>
    %25 = vector.shape_cast %24 : vector<1x4x4xf32> to vector<4x4xf32>
    %cst_16 = arith.constant dense<0.000000e+00> : vector<4x256xf32>
    %26 = tpu.matmul %25, %23, %cst_16 {dimension_numbers = #tpu.dot_dimension_numbers<[1], [0], [0], [1], [0, 0, 1, 1], [], []>} : vector<4x4xf32>, vector<4x256xf32>, vector<4x256xf32> -> vector<4x256xf32>
    %27 = arith.addf %22, %26 : vector<4x256xf32>
    %28 = vector.extract_strided_slice %15 {offsets = [0, 143], sizes = [4, 256], strides = [1, 1]} : vector<4x512xf32> to vector<4x256xf32>
    %29 = vector.extract_strided_slice %16 {offsets = [6, 0, 0], sizes = [1, 4, 4], strides = [1, 1, 1]} : vector<9x4x4xf32> to vector<1x4x4xf32>
    %30 = vector.shape_cast %29 : vector<1x4x4xf32> to vector<4x4xf32>
    %cst_17 = arith.constant dense<0.000000e+00> : vector<4x256xf32>
    %31 = tpu.matmul %30, %28, %cst_17 {dimension_numbers = #tpu.dot_dimension_numbers<[1], [0], [0], [1], [0, 0, 1, 1], [], []>} : vector<4x4xf32>, vector<4x256xf32>, vector<4x256xf32> -> vector<4x256xf32>
    %32 = arith.addf %27, %31 : vector<4x256xf32>
    %cst_18 = arith.constant 0.000000e+00 : f32
    %33 = vector.broadcast %cst_18 : f32 to vector<4x256xf32>
    %34 = vector.extract_strided_slice %15 {offsets = [0, 112], sizes = [4, 256], strides = [1, 1]} : vector<4x512xf32> to vector<4x256xf32>
    %35 = vector.extract_strided_slice %16 {offsets = [1, 0, 0], sizes = [1, 4, 4], strides = [1, 1, 1]} : vector<9x4x4xf32> to vector<1x4x4xf32>
    %36 = vector.shape_cast %35 : vector<1x4x4xf32> to vector<4x4xf32>
    %cst_19 = arith.constant dense<0.000000e+00> : vector<4x256xf32>
    %37 = tpu.matmul %36, %34, %cst_19 {dimension_numbers = #tpu.dot_dimension_numbers<[1], [0], [0], [1], [0, 0, 1, 1], [], []>} : vector<4x4xf32>, vector<4x256xf32>, vector<4x256xf32> -> vector<4x256xf32>
    %38 = arith.addf %33, %37 : vector<4x256xf32>
    %39 = vector.extract_strided_slice %15 {offsets = [0, 128], sizes = [4, 256], strides = [1, 1]} : vector<4x512xf32> to vector<4x256xf32>
    %40 = vector.extract_strided_slice %16 {offsets = [4, 0, 0], sizes = [1, 4, 4], strides = [1, 1, 1]} : vector<9x4x4xf32> to vector<1x4x4xf32>
    %41 = vector.shape_cast %40 : vector<1x4x4xf32> to vector<4x4xf32>
    %cst_20 = arith.constant dense<0.000000e+00> : vector<4x256xf32>
    %42 = tpu.matmul %41, %39, %cst_20 {dimension_numbers = #tpu.dot_dimension_numbers<[1], [0], [0], [1], [0, 0, 1, 1], [], []>} : vector<4x4xf32>, vector<4x256xf32>, vector<4x256xf32> -> vector<4x256xf32>
    %43 = arith.addf %38, %42 : vector<4x256xf32>
    %44 = vector.extract_strided_slice %15 {offsets = [0, 144], sizes = [4, 256], strides = [1, 1]} : vector<4x512xf32> to vector<4x256xf32>
    %45 = vector.extract_strided_slice %16 {offsets = [7, 0, 0], sizes = [1, 4, 4], strides = [1, 1, 1]} : vector<9x4x4xf32> to vector<1x4x4xf32>
    %46 = vector.shape_cast %45 : vector<1x4x4xf32> to vector<4x4xf32>
    %cst_21 = arith.constant dense<0.000000e+00> : vector<4x256xf32>
    %47 = tpu.matmul %46, %44, %cst_21 {dimension_numbers = #tpu.dot_dimension_numbers<[1], [0], [0], [1], [0, 0, 1, 1], [], []>} : vector<4x4xf32>, vector<4x256xf32>, vector<4x256xf32> -> vector<4x256xf32>
    %48 = arith.addf %43, %47 : vector<4x256xf32>
    %cst_22 = arith.constant 0.000000e+00 : f32
    %49 = vector.broadcast %cst_22 : f32 to vector<4x256xf32>
    %50 = vector.extract_strided_slice %15 {offsets = [0, 113], sizes = [4, 256], strides = [1, 1]} : vector<4x512xf32> to vector<4x256xf32>
    %51 = vector.extract_strided_slice %16 {offsets = [2, 0, 0], sizes = [1, 4, 4], strides = [1, 1, 1]} : vector<9x4x4xf32> to vector<1x4x4xf32>
    %52 = vector.shape_cast %51 : vector<1x4x4xf32> to vector<4x4xf32>
    %cst_23 = arith.constant dense<0.000000e+00> : vector<4x256xf32>
    %53 = tpu.matmul %52, %50, %cst_23 {dimension_numbers = #tpu.dot_dimension_numbers<[1], [0], [0], [1], [0, 0, 1, 1], [], []>} : vector<4x4xf32>, vector<4x256xf32>, vector<4x256xf32> -> vector<4x256xf32>
    %54 = arith.addf %49, %53 : vector<4x256xf32>
    %55 = vector.extract_strided_slice %15 {offsets = [0, 129], sizes = [4, 256], strides = [1, 1]} : vector<4x512xf32> to vector<4x256xf32>
    %56 = vector.extract_strided_slice %16 {offsets = [5, 0, 0], sizes = [1, 4, 4], strides = [1, 1, 1]} : vector<9x4x4xf32> to vector<1x4x4xf32>
    %57 = vector.shape_cast %56 : vector<1x4x4xf32> to vector<4x4xf32>
    %cst_24 = arith.constant dense<0.000000e+00> : vector<4x256xf32>
    %58 = tpu.matmul %57, %55, %cst_24 {dimension_numbers = #tpu.dot_dimension_numbers<[1], [0], [0], [1], [0, 0, 1, 1], [], []>} : vector<4x4xf32>, vector<4x256xf32>, vector<4x256xf32> -> vector<4x256xf32>
    %59 = arith.addf %54, %58 : vector<4x256xf32>
    %60 = vector.extract_strided_slice %15 {offsets = [0, 145], sizes = [4, 256], strides = [1, 1]} : vector<4x512xf32> to vector<4x256xf32>
    %61 = vector.extract_strided_slice %16 {offsets = [8, 0, 0], sizes = [1, 4, 4], strides = [1, 1, 1]} : vector<9x4x4xf32> to vector<1x4x4xf32>
    %62 = vector.shape_cast %61 : vector<1x4x4xf32> to vector<4x4xf32>
    %cst_25 = arith.constant dense<0.000000e+00> : vector<4x256xf32>
    %63 = tpu.matmul %62, %60, %cst_25 {dimension_numbers = #tpu.dot_dimension_numbers<[1], [0], [0], [1], [0, 0, 1, 1], [], []>} : vector<4x4xf32>, vector<4x256xf32>, vector<4x256xf32> -> vector<4x256xf32>
    %64 = arith.addf %59, %63 : vector<4x256xf32>
    %65 = vector.broadcast %1 : vector<1x256xf32> to vector<4x256xf32>
    %66 = arith.mulf %65, %32 : vector<4x256xf32>
    %67 = arith.addf %48, %66 : vector<4x256xf32>
    %68 = vector.broadcast %2 : vector<1x256xf32> to vector<4x256xf32>
    %69 = arith.mulf %68, %64 : vector<4x256xf32>
    %70 = arith.addf %67, %69 : vector<4x256xf32>
    %c0_26 = arith.constant 0 : index
    %c0_27 = arith.constant 0 : index
    %71 = vector.load %arg6[%c0_26, %c0_27] : memref<4x1xf32, #tpu.memory_space<vmem>>, vector<4x1xf32>
    %72 = vector.broadcast %71 : vector<4x1xf32> to vector<4x256xf32>
    %73 = arith.addf %70, %72 : vector<4x256xf32>
    %cst_28 = arith.constant 0.000000e+00 : f32
    %74 = vector.broadcast %cst_28 : f32 to vector<4x256xf32>
    %75 = arith.maximumf %73, %74 : vector<4x256xf32>
    %cst_29 = arith.constant 0.000000e+00 : f32
    %76 = vector.broadcast %cst_29 : f32 to vector<4x256xf32>
    %77 = arith.maximumf %4, %76 : vector<4x256xf32>
    %c0_30 = arith.constant 0 : index
    %c0_31 = arith.constant 0 : index
    %78 = vector.load %arg7[%c0_30, %c0_31] : memref<8x8xf32, #tpu.memory_space<vmem>>, vector<8x8xf32>
    %cst_32 = arith.constant 0.000000e+00 : f32
    %79 = vector.broadcast %cst_32 : f32 to vector<8x256xf32>
    %80 = vector.extract_strided_slice %78 {offsets = [0, 0], sizes = [8, 4], strides = [1, 1]} : vector<8x8xf32> to vector<8x4xf32>
    %cst_33 = arith.constant dense<0.000000e+00> : vector<8x256xf32>
    %81 = tpu.matmul %80, %77, %cst_33 {dimension_numbers = #tpu.dot_dimension_numbers<[1], [0], [0], [1], [0, 0, 1, 1], [], []>} : vector<8x4xf32>, vector<4x256xf32>, vector<8x256xf32> -> vector<8x256xf32>
    %82 = arith.addf %79, %81 : vector<8x256xf32>
    %83 = vector.extract_strided_slice %78 {offsets = [0, 4], sizes = [8, 4], strides = [1, 1]} : vector<8x8xf32> to vector<8x4xf32>
    %cst_34 = arith.constant dense<0.000000e+00> : vector<8x256xf32>
    %84 = tpu.matmul %83, %75, %cst_34 {dimension_numbers = #tpu.dot_dimension_numbers<[1], [0], [0], [1], [0, 0, 1, 1], [], []>} : vector<8x4xf32>, vector<4x256xf32>, vector<8x256xf32> -> vector<8x256xf32>
    %85 = arith.addf %82, %84 : vector<8x256xf32>
    %c0_35 = arith.constant 0 : index
    %c0_36 = arith.constant 0 : index
    %86 = vector.load %arg8[%c0_35, %c0_36] : memref<8x1xf32, #tpu.memory_space<vmem>>, vector<8x1xf32>
    %87 = vector.broadcast %86 : vector<8x1xf32> to vector<8x256xf32>
    %88 = arith.addf %85, %87 : vector<8x256xf32>
    %cst_37 = arith.constant 0.000000e+00 : f32
    %89 = vector.broadcast %cst_37 : f32 to vector<8x256xf32>
    %90 = arith.maximumf %88, %89 : vector<8x256xf32>
    %cst_38 = arith.constant 0.000000e+00 : f32
    %91 = vector.broadcast %cst_38 : f32 to vector<8x128xf32>
    %92 = tpu.concatenate %91, %90, %91 in 1 : vector<8x128xf32>, vector<8x256xf32>, vector<8x128xf32> -> vector<8x512xf32>
    %c0_39 = arith.constant 0 : index
    %c0_40 = arith.constant 0 : index
    %c0_41 = arith.constant 0 : index
    %93 = vector.load %arg9[%c0_39, %c0_40, %c0_41] : memref<9x4x8xf32, #tpu.memory_space<vmem>>, vector<9x4x8xf32>
    %cst_42 = arith.constant 0.000000e+00 : f32
    %94 = vector.broadcast %cst_42 : f32 to vector<4x256xf32>
    %95 = vector.extract_strided_slice %92 {offsets = [0, 111], sizes = [8, 256], strides = [1, 1]} : vector<8x512xf32> to vector<8x256xf32>
    %96 = vector.extract_strided_slice %93 {offsets = [0, 0, 0], sizes = [1, 4, 8], strides = [1, 1, 1]} : vector<9x4x8xf32> to vector<1x4x8xf32>
    %97 = vector.shape_cast %96 : vector<1x4x8xf32> to vector<4x8xf32>
    %cst_43 = arith.constant dense<0.000000e+00> : vector<4x256xf32>
    %98 = tpu.matmul %97, %95, %cst_43 {dimension_numbers = #tpu.dot_dimension_numbers<[1], [0], [0], [1], [0, 0, 1, 1], [], []>} : vector<4x8xf32>, vector<8x256xf32>, vector<4x256xf32> -> vector<4x256xf32>
    %99 = arith.addf %94, %98 : vector<4x256xf32>
    %100 = vector.extract_strided_slice %92 {offsets = [0, 127], sizes = [8, 256], strides = [1, 1]} : vector<8x512xf32> to vector<8x256xf32>
    %101 = vector.extract_strided_slice %93 {offsets = [3, 0, 0], sizes = [1, 4, 8], strides = [1, 1, 1]} : vector<9x4x8xf32> to vector<1x4x8xf32>
    %102 = vector.shape_cast %101 : vector<1x4x8xf32> to vector<4x8xf32>
    %cst_44 = arith.constant dense<0.000000e+00> : vector<4x256xf32>
    %103 = tpu.matmul %102, %100, %cst_44 {dimension_numbers = #tpu.dot_dimension_numbers<[1], [0], [0], [1], [0, 0, 1, 1], [], []>} : vector<4x8xf32>, vector<8x256xf32>, vector<4x256xf32> -> vector<4x256xf32>
    %104 = arith.addf %99, %103 : vector<4x256xf32>
    %105 = vector.extract_strided_slice %92 {offsets = [0, 143], sizes = [8, 256], strides = [1, 1]} : vector<8x512xf32> to vector<8x256xf32>
    %106 = vector.extract_strided_slice %93 {offsets = [6, 0, 0], sizes = [1, 4, 8], strides = [1, 1, 1]} : vector<9x4x8xf32> to vector<1x4x8xf32>
    %107 = vector.shape_cast %106 : vector<1x4x8xf32> to vector<4x8xf32>
    %cst_45 = arith.constant dense<0.000000e+00> : vector<4x256xf32>
    %108 = tpu.matmul %107, %105, %cst_45 {dimension_numbers = #tpu.dot_dimension_numbers<[1], [0], [0], [1], [0, 0, 1, 1], [], []>} : vector<4x8xf32>, vector<8x256xf32>, vector<4x256xf32> -> vector<4x256xf32>
    %109 = arith.addf %104, %108 : vector<4x256xf32>
    %cst_46 = arith.constant 0.000000e+00 : f32
    %110 = vector.broadcast %cst_46 : f32 to vector<4x256xf32>
    %111 = vector.extract_strided_slice %92 {offsets = [0, 112], sizes = [8, 256], strides = [1, 1]} : vector<8x512xf32> to vector<8x256xf32>
    %112 = vector.extract_strided_slice %93 {offsets = [1, 0, 0], sizes = [1, 4, 8], strides = [1, 1, 1]} : vector<9x4x8xf32> to vector<1x4x8xf32>
    %113 = vector.shape_cast %112 : vector<1x4x8xf32> to vector<4x8xf32>
    %cst_47 = arith.constant dense<0.000000e+00> : vector<4x256xf32>
    %114 = tpu.matmul %113, %111, %cst_47 {dimension_numbers = #tpu.dot_dimension_numbers<[1], [0], [0], [1], [0, 0, 1, 1], [], []>} : vector<4x8xf32>, vector<8x256xf32>, vector<4x256xf32> -> vector<4x256xf32>
    %115 = arith.addf %110, %114 : vector<4x256xf32>
    %116 = vector.extract_strided_slice %92 {offsets = [0, 128], sizes = [8, 256], strides = [1, 1]} : vector<8x512xf32> to vector<8x256xf32>
    %117 = vector.extract_strided_slice %93 {offsets = [4, 0, 0], sizes = [1, 4, 8], strides = [1, 1, 1]} : vector<9x4x8xf32> to vector<1x4x8xf32>
    %118 = vector.shape_cast %117 : vector<1x4x8xf32> to vector<4x8xf32>
    %cst_48 = arith.constant dense<0.000000e+00> : vector<4x256xf32>
    %119 = tpu.matmul %118, %116, %cst_48 {dimension_numbers = #tpu.dot_dimension_numbers<[1], [0], [0], [1], [0, 0, 1, 1], [], []>} : vector<4x8xf32>, vector<8x256xf32>, vector<4x256xf32> -> vector<4x256xf32>
    %120 = arith.addf %115, %119 : vector<4x256xf32>
    %121 = vector.extract_strided_slice %92 {offsets = [0, 144], sizes = [8, 256], strides = [1, 1]} : vector<8x512xf32> to vector<8x256xf32>
    %122 = vector.extract_strided_slice %93 {offsets = [7, 0, 0], sizes = [1, 4, 8], strides = [1, 1, 1]} : vector<9x4x8xf32> to vector<1x4x8xf32>
    %123 = vector.shape_cast %122 : vector<1x4x8xf32> to vector<4x8xf32>
    %cst_49 = arith.constant dense<0.000000e+00> : vector<4x256xf32>
    %124 = tpu.matmul %123, %121, %cst_49 {dimension_numbers = #tpu.dot_dimension_numbers<[1], [0], [0], [1], [0, 0, 1, 1], [], []>} : vector<4x8xf32>, vector<8x256xf32>, vector<4x256xf32> -> vector<4x256xf32>
    %125 = arith.addf %120, %124 : vector<4x256xf32>
    %cst_50 = arith.constant 0.000000e+00 : f32
    %126 = vector.broadcast %cst_50 : f32 to vector<4x256xf32>
    %127 = vector.extract_strided_slice %92 {offsets = [0, 113], sizes = [8, 256], strides = [1, 1]} : vector<8x512xf32> to vector<8x256xf32>
    %128 = vector.extract_strided_slice %93 {offsets = [2, 0, 0], sizes = [1, 4, 8], strides = [1, 1, 1]} : vector<9x4x8xf32> to vector<1x4x8xf32>
    %129 = vector.shape_cast %128 : vector<1x4x8xf32> to vector<4x8xf32>
    %cst_51 = arith.constant dense<0.000000e+00> : vector<4x256xf32>
    %130 = tpu.matmul %129, %127, %cst_51 {dimension_numbers = #tpu.dot_dimension_numbers<[1], [0], [0], [1], [0, 0, 1, 1], [], []>} : vector<4x8xf32>, vector<8x256xf32>, vector<4x256xf32> -> vector<4x256xf32>
    %131 = arith.addf %126, %130 : vector<4x256xf32>
    %132 = vector.extract_strided_slice %92 {offsets = [0, 129], sizes = [8, 256], strides = [1, 1]} : vector<8x512xf32> to vector<8x256xf32>
    %133 = vector.extract_strided_slice %93 {offsets = [5, 0, 0], sizes = [1, 4, 8], strides = [1, 1, 1]} : vector<9x4x8xf32> to vector<1x4x8xf32>
    %134 = vector.shape_cast %133 : vector<1x4x8xf32> to vector<4x8xf32>
    %cst_52 = arith.constant dense<0.000000e+00> : vector<4x256xf32>
    %135 = tpu.matmul %134, %132, %cst_52 {dimension_numbers = #tpu.dot_dimension_numbers<[1], [0], [0], [1], [0, 0, 1, 1], [], []>} : vector<4x8xf32>, vector<8x256xf32>, vector<4x256xf32> -> vector<4x256xf32>
    %136 = arith.addf %131, %135 : vector<4x256xf32>
    %137 = vector.extract_strided_slice %92 {offsets = [0, 145], sizes = [8, 256], strides = [1, 1]} : vector<8x512xf32> to vector<8x256xf32>
    %138 = vector.extract_strided_slice %93 {offsets = [8, 0, 0], sizes = [1, 4, 8], strides = [1, 1, 1]} : vector<9x4x8xf32> to vector<1x4x8xf32>
    %139 = vector.shape_cast %138 : vector<1x4x8xf32> to vector<4x8xf32>
    %cst_53 = arith.constant dense<0.000000e+00> : vector<4x256xf32>
    %140 = tpu.matmul %139, %137, %cst_53 {dimension_numbers = #tpu.dot_dimension_numbers<[1], [0], [0], [1], [0, 0, 1, 1], [], []>} : vector<4x8xf32>, vector<8x256xf32>, vector<4x256xf32> -> vector<4x256xf32>
    %141 = arith.addf %136, %140 : vector<4x256xf32>
    %142 = vector.broadcast %1 : vector<1x256xf32> to vector<4x256xf32>
    %143 = arith.mulf %142, %109 : vector<4x256xf32>
    %144 = arith.addf %125, %143 : vector<4x256xf32>
    %145 = vector.broadcast %2 : vector<1x256xf32> to vector<4x256xf32>
    %146 = arith.mulf %145, %141 : vector<4x256xf32>
    %147 = arith.addf %144, %146 : vector<4x256xf32>
    %c0_54 = arith.constant 0 : index
    %c0_55 = arith.constant 0 : index
    %148 = vector.load %arg10[%c0_54, %c0_55] : memref<4x1xf32, #tpu.memory_space<vmem>>, vector<4x1xf32>
    %149 = vector.broadcast %148 : vector<4x1xf32> to vector<4x256xf32>
    %150 = arith.addf %147, %149 : vector<4x256xf32>
    %cst_56 = arith.constant 0.000000e+00 : f32
    %151 = vector.broadcast %cst_56 : f32 to vector<4x256xf32>
    %152 = arith.maximumf %150, %151 : vector<4x256xf32>
    %c0_57 = arith.constant 0 : index
    %c0_58 = arith.constant 0 : index
    %153 = vector.load %arg11[%c0_57, %c0_58] : memref<12x12xf32, #tpu.memory_space<vmem>>, vector<12x12xf32>
    %cst_59 = arith.constant 0.000000e+00 : f32
    %154 = vector.broadcast %cst_59 : f32 to vector<12x256xf32>
    %155 = vector.extract_strided_slice %153 {offsets = [0, 0], sizes = [12, 4], strides = [1, 1]} : vector<12x12xf32> to vector<12x4xf32>
    %cst_60 = arith.constant dense<0.000000e+00> : vector<12x256xf32>
    %156 = tpu.matmul %155, %77, %cst_60 {dimension_numbers = #tpu.dot_dimension_numbers<[1], [0], [0], [1], [0, 0, 1, 1], [], []>} : vector<12x4xf32>, vector<4x256xf32>, vector<12x256xf32> -> vector<12x256xf32>
    %157 = arith.addf %154, %156 : vector<12x256xf32>
    %158 = vector.extract_strided_slice %153 {offsets = [0, 4], sizes = [12, 4], strides = [1, 1]} : vector<12x12xf32> to vector<12x4xf32>
    %cst_61 = arith.constant dense<0.000000e+00> : vector<12x256xf32>
    %159 = tpu.matmul %158, %75, %cst_61 {dimension_numbers = #tpu.dot_dimension_numbers<[1], [0], [0], [1], [0, 0, 1, 1], [], []>} : vector<12x4xf32>, vector<4x256xf32>, vector<12x256xf32> -> vector<12x256xf32>
    %160 = arith.addf %157, %159 : vector<12x256xf32>
    %161 = vector.extract_strided_slice %153 {offsets = [0, 8], sizes = [12, 4], strides = [1, 1]} : vector<12x12xf32> to vector<12x4xf32>
    %cst_62 = arith.constant dense<0.000000e+00> : vector<12x256xf32>
    %162 = tpu.matmul %161, %152, %cst_62 {dimension_numbers = #tpu.dot_dimension_numbers<[1], [0], [0], [1], [0, 0, 1, 1], [], []>} : vector<12x4xf32>, vector<4x256xf32>, vector<12x256xf32> -> vector<12x256xf32>
    %163 = arith.addf %160, %162 : vector<12x256xf32>
    %c0_63 = arith.constant 0 : index
    %c0_64 = arith.constant 0 : index
    %164 = vector.load %arg12[%c0_63, %c0_64] : memref<12x1xf32, #tpu.memory_space<vmem>>, vector<12x1xf32>
    %165 = vector.broadcast %164 : vector<12x1xf32> to vector<12x256xf32>
    %166 = arith.addf %163, %165 : vector<12x256xf32>
    %cst_65 = arith.constant 0.000000e+00 : f32
    %167 = vector.broadcast %cst_65 : f32 to vector<12x256xf32>
    %168 = arith.maximumf %166, %167 : vector<12x256xf32>
    %cst_66 = arith.constant 0.000000e+00 : f32
    %169 = vector.broadcast %cst_66 : f32 to vector<12x128xf32>
    %170 = tpu.concatenate %169, %168, %169 in 1 : vector<12x128xf32>, vector<12x256xf32>, vector<12x128xf32> -> vector<12x512xf32>
    %c0_67 = arith.constant 0 : index
    %c0_68 = arith.constant 0 : index
    %c0_69 = arith.constant 0 : index
    %171 = vector.load %arg13[%c0_67, %c0_68, %c0_69] : memref<9x4x12xf32, #tpu.memory_space<vmem>>, vector<9x4x12xf32>
    %cst_70 = arith.constant 0.000000e+00 : f32
    %172 = vector.broadcast %cst_70 : f32 to vector<4x256xf32>
    %173 = vector.extract_strided_slice %170 {offsets = [0, 111], sizes = [12, 256], strides = [1, 1]} : vector<12x512xf32> to vector<12x256xf32>
    %174 = vector.extract_strided_slice %171 {offsets = [0, 0, 0], sizes = [1, 4, 12], strides = [1, 1, 1]} : vector<9x4x12xf32> to vector<1x4x12xf32>
    %175 = vector.shape_cast %174 : vector<1x4x12xf32> to vector<4x12xf32>
    %cst_71 = arith.constant dense<0.000000e+00> : vector<4x256xf32>
    %176 = tpu.matmul %175, %173, %cst_71 {dimension_numbers = #tpu.dot_dimension_numbers<[1], [0], [0], [1], [0, 0, 1, 1], [], []>} : vector<4x12xf32>, vector<12x256xf32>, vector<4x256xf32> -> vector<4x256xf32>
    %177 = arith.addf %172, %176 : vector<4x256xf32>
    %178 = vector.extract_strided_slice %170 {offsets = [0, 127], sizes = [12, 256], strides = [1, 1]} : vector<12x512xf32> to vector<12x256xf32>
    %179 = vector.extract_strided_slice %171 {offsets = [3, 0, 0], sizes = [1, 4, 12], strides = [1, 1, 1]} : vector<9x4x12xf32> to vector<1x4x12xf32>
    %180 = vector.shape_cast %179 : vector<1x4x12xf32> to vector<4x12xf32>
    %cst_72 = arith.constant dense<0.000000e+00> : vector<4x256xf32>
    %181 = tpu.matmul %180, %178, %cst_72 {dimension_numbers = #tpu.dot_dimension_numbers<[1], [0], [0], [1], [0, 0, 1, 1], [], []>} : vector<4x12xf32>, vector<12x256xf32>, vector<4x256xf32> -> vector<4x256xf32>
    %182 = arith.addf %177, %181 : vector<4x256xf32>
    %183 = vector.extract_strided_slice %170 {offsets = [0, 143], sizes = [12, 256], strides = [1, 1]} : vector<12x512xf32> to vector<12x256xf32>
    %184 = vector.extract_strided_slice %171 {offsets = [6, 0, 0], sizes = [1, 4, 12], strides = [1, 1, 1]} : vector<9x4x12xf32> to vector<1x4x12xf32>
    %185 = vector.shape_cast %184 : vector<1x4x12xf32> to vector<4x12xf32>
    %cst_73 = arith.constant dense<0.000000e+00> : vector<4x256xf32>
    %186 = tpu.matmul %185, %183, %cst_73 {dimension_numbers = #tpu.dot_dimension_numbers<[1], [0], [0], [1], [0, 0, 1, 1], [], []>} : vector<4x12xf32>, vector<12x256xf32>, vector<4x256xf32> -> vector<4x256xf32>
    %187 = arith.addf %182, %186 : vector<4x256xf32>
    %cst_74 = arith.constant 0.000000e+00 : f32
    %188 = vector.broadcast %cst_74 : f32 to vector<4x256xf32>
    %189 = vector.extract_strided_slice %170 {offsets = [0, 112], sizes = [12, 256], strides = [1, 1]} : vector<12x512xf32> to vector<12x256xf32>
    %190 = vector.extract_strided_slice %171 {offsets = [1, 0, 0], sizes = [1, 4, 12], strides = [1, 1, 1]} : vector<9x4x12xf32> to vector<1x4x12xf32>
    %191 = vector.shape_cast %190 : vector<1x4x12xf32> to vector<4x12xf32>
    %cst_75 = arith.constant dense<0.000000e+00> : vector<4x256xf32>
    %192 = tpu.matmul %191, %189, %cst_75 {dimension_numbers = #tpu.dot_dimension_numbers<[1], [0], [0], [1], [0, 0, 1, 1], [], []>} : vector<4x12xf32>, vector<12x256xf32>, vector<4x256xf32> -> vector<4x256xf32>
    %193 = arith.addf %188, %192 : vector<4x256xf32>
    %194 = vector.extract_strided_slice %170 {offsets = [0, 128], sizes = [12, 256], strides = [1, 1]} : vector<12x512xf32> to vector<12x256xf32>
    %195 = vector.extract_strided_slice %171 {offsets = [4, 0, 0], sizes = [1, 4, 12], strides = [1, 1, 1]} : vector<9x4x12xf32> to vector<1x4x12xf32>
    %196 = vector.shape_cast %195 : vector<1x4x12xf32> to vector<4x12xf32>
    %cst_76 = arith.constant dense<0.000000e+00> : vector<4x256xf32>
    %197 = tpu.matmul %196, %194, %cst_76 {dimension_numbers = #tpu.dot_dimension_numbers<[1], [0], [0], [1], [0, 0, 1, 1], [], []>} : vector<4x12xf32>, vector<12x256xf32>, vector<4x256xf32> -> vector<4x256xf32>
    %198 = arith.addf %193, %197 : vector<4x256xf32>
    %199 = vector.extract_strided_slice %170 {offsets = [0, 144], sizes = [12, 256], strides = [1, 1]} : vector<12x512xf32> to vector<12x256xf32>
    %200 = vector.extract_strided_slice %171 {offsets = [7, 0, 0], sizes = [1, 4, 12], strides = [1, 1, 1]} : vector<9x4x12xf32> to vector<1x4x12xf32>
    %201 = vector.shape_cast %200 : vector<1x4x12xf32> to vector<4x12xf32>
    %cst_77 = arith.constant dense<0.000000e+00> : vector<4x256xf32>
    %202 = tpu.matmul %201, %199, %cst_77 {dimension_numbers = #tpu.dot_dimension_numbers<[1], [0], [0], [1], [0, 0, 1, 1], [], []>} : vector<4x12xf32>, vector<12x256xf32>, vector<4x256xf32> -> vector<4x256xf32>
    %203 = arith.addf %198, %202 : vector<4x256xf32>
    %cst_78 = arith.constant 0.000000e+00 : f32
    %204 = vector.broadcast %cst_78 : f32 to vector<4x256xf32>
    %205 = vector.extract_strided_slice %170 {offsets = [0, 113], sizes = [12, 256], strides = [1, 1]} : vector<12x512xf32> to vector<12x256xf32>
    %206 = vector.extract_strided_slice %171 {offsets = [2, 0, 0], sizes = [1, 4, 12], strides = [1, 1, 1]} : vector<9x4x12xf32> to vector<1x4x12xf32>
    %207 = vector.shape_cast %206 : vector<1x4x12xf32> to vector<4x12xf32>
    %cst_79 = arith.constant dense<0.000000e+00> : vector<4x256xf32>
    %208 = tpu.matmul %207, %205, %cst_79 {dimension_numbers = #tpu.dot_dimension_numbers<[1], [0], [0], [1], [0, 0, 1, 1], [], []>} : vector<4x12xf32>, vector<12x256xf32>, vector<4x256xf32> -> vector<4x256xf32>
    %209 = arith.addf %204, %208 : vector<4x256xf32>
    %210 = vector.extract_strided_slice %170 {offsets = [0, 129], sizes = [12, 256], strides = [1, 1]} : vector<12x512xf32> to vector<12x256xf32>
    %211 = vector.extract_strided_slice %171 {offsets = [5, 0, 0], sizes = [1, 4, 12], strides = [1, 1, 1]} : vector<9x4x12xf32> to vector<1x4x12xf32>
    %212 = vector.shape_cast %211 : vector<1x4x12xf32> to vector<4x12xf32>
    %cst_80 = arith.constant dense<0.000000e+00> : vector<4x256xf32>
    %213 = tpu.matmul %212, %210, %cst_80 {dimension_numbers = #tpu.dot_dimension_numbers<[1], [0], [0], [1], [0, 0, 1, 1], [], []>} : vector<4x12xf32>, vector<12x256xf32>, vector<4x256xf32> -> vector<4x256xf32>
    %214 = arith.addf %209, %213 : vector<4x256xf32>
    %215 = vector.extract_strided_slice %170 {offsets = [0, 145], sizes = [12, 256], strides = [1, 1]} : vector<12x512xf32> to vector<12x256xf32>
    %216 = vector.extract_strided_slice %171 {offsets = [8, 0, 0], sizes = [1, 4, 12], strides = [1, 1, 1]} : vector<9x4x12xf32> to vector<1x4x12xf32>
    %217 = vector.shape_cast %216 : vector<1x4x12xf32> to vector<4x12xf32>
    %cst_81 = arith.constant dense<0.000000e+00> : vector<4x256xf32>
    %218 = tpu.matmul %217, %215, %cst_81 {dimension_numbers = #tpu.dot_dimension_numbers<[1], [0], [0], [1], [0, 0, 1, 1], [], []>} : vector<4x12xf32>, vector<12x256xf32>, vector<4x256xf32> -> vector<4x256xf32>
    %219 = arith.addf %214, %218 : vector<4x256xf32>
    %220 = vector.broadcast %1 : vector<1x256xf32> to vector<4x256xf32>
    %221 = arith.mulf %220, %187 : vector<4x256xf32>
    %222 = arith.addf %203, %221 : vector<4x256xf32>
    %223 = vector.broadcast %2 : vector<1x256xf32> to vector<4x256xf32>
    %224 = arith.mulf %223, %219 : vector<4x256xf32>
    %225 = arith.addf %222, %224 : vector<4x256xf32>
    %c0_82 = arith.constant 0 : index
    %c0_83 = arith.constant 0 : index
    %226 = vector.load %arg14[%c0_82, %c0_83] : memref<4x1xf32, #tpu.memory_space<vmem>>, vector<4x1xf32>
    %227 = vector.broadcast %226 : vector<4x1xf32> to vector<4x256xf32>
    %228 = arith.addf %225, %227 : vector<4x256xf32>
    %cst_84 = arith.constant 0.000000e+00 : f32
    %229 = vector.broadcast %cst_84 : f32 to vector<4x256xf32>
    %230 = arith.maximumf %228, %229 : vector<4x256xf32>
    %c0_85 = arith.constant 0 : index
    %c0_86 = arith.constant 0 : index
    %231 = vector.load %arg15[%c0_85, %c0_86] : memref<4x16xf32, #tpu.memory_space<vmem>>, vector<4x16xf32>
    %c0_87 = arith.constant 0 : index
    %c0_88 = arith.constant 0 : index
    %232 = vector.load %arg16[%c0_87, %c0_88] : memref<4x1xf32, #tpu.memory_space<vmem>>, vector<4x1xf32>
    %cst_89 = arith.constant 0.000000e+00 : f32
    %233 = vector.broadcast %cst_89 : f32 to vector<4x256xf32>
    %234 = vector.extract_strided_slice %231 {offsets = [0, 0], sizes = [4, 4], strides = [1, 1]} : vector<4x16xf32> to vector<4x4xf32>
    %cst_90 = arith.constant dense<0.000000e+00> : vector<4x256xf32>
    %235 = tpu.matmul %234, %77, %cst_90 {dimension_numbers = #tpu.dot_dimension_numbers<[1], [0], [0], [1], [0, 0, 1, 1], [], []>} : vector<4x4xf32>, vector<4x256xf32>, vector<4x256xf32> -> vector<4x256xf32>
    %236 = arith.addf %233, %235 : vector<4x256xf32>
    %237 = vector.extract_strided_slice %231 {offsets = [0, 4], sizes = [4, 4], strides = [1, 1]} : vector<4x16xf32> to vector<4x4xf32>
    %cst_91 = arith.constant dense<0.000000e+00> : vector<4x256xf32>
    %238 = tpu.matmul %237, %75, %cst_91 {dimension_numbers = #tpu.dot_dimension_numbers<[1], [0], [0], [1], [0, 0, 1, 1], [], []>} : vector<4x4xf32>, vector<4x256xf32>, vector<4x256xf32> -> vector<4x256xf32>
    %239 = arith.addf %236, %238 : vector<4x256xf32>
    %240 = vector.extract_strided_slice %231 {offsets = [0, 8], sizes = [4, 4], strides = [1, 1]} : vector<4x16xf32> to vector<4x4xf32>
    %cst_92 = arith.constant dense<0.000000e+00> : vector<4x256xf32>
    %241 = tpu.matmul %240, %152, %cst_92 {dimension_numbers = #tpu.dot_dimension_numbers<[1], [0], [0], [1], [0, 0, 1, 1], [], []>} : vector<4x4xf32>, vector<4x256xf32>, vector<4x256xf32> -> vector<4x256xf32>
    %242 = arith.addf %239, %241 : vector<4x256xf32>
    %243 = vector.extract_strided_slice %231 {offsets = [0, 12], sizes = [4, 4], strides = [1, 1]} : vector<4x16xf32> to vector<4x4xf32>
    %cst_93 = arith.constant dense<0.000000e+00> : vector<4x256xf32>
    %244 = tpu.matmul %243, %230, %cst_93 {dimension_numbers = #tpu.dot_dimension_numbers<[1], [0], [0], [1], [0, 0, 1, 1], [], []>} : vector<4x4xf32>, vector<4x256xf32>, vector<4x256xf32> -> vector<4x256xf32>
    %245 = arith.addf %242, %244 : vector<4x256xf32>
    %246 = vector.broadcast %232 : vector<4x1xf32> to vector<4x256xf32>
    %247 = arith.addf %245, %246 : vector<4x256xf32>
    %cst_94 = arith.constant 0.000000e+00 : f32
    %248 = vector.broadcast %cst_94 : f32 to vector<4x256xf32>
    %249 = arith.maximumf %247, %248 : vector<4x256xf32>
    %250 = vector.shape_cast %249 : vector<4x256xf32> to vector<1x4x256xf32>
    %c0_95 = arith.constant 0 : index
    %c0_96 = arith.constant 0 : index
    %c0_97 = arith.constant 0 : index
    %251 = vector.load %arg17[%c0_95, %c0_96, %c0_97] : memref<1x4x256xf32, #tpu.memory_space<vmem>>, vector<1x4x256xf32>
    tpu.vector_store %arg17[%c0_95, %c0_96, %c0_97], %250 {strides = array<i32>} : memref<1x4x256xf32, #tpu.memory_space<vmem>>, vector<1x4x256xf32>,
    return
  }
  func.func @transform_0(%arg0: i32) -> (i32, i32, i32) {
    %c0_i32 = arith.constant 0 : i32
    %c0_i32_0 = arith.constant 0 : i32
    %c0_i32_1 = arith.constant 0 : i32
    return %arg0, %c0_i32, %c0_i32_0 : i32, i32, i32
  }
  func.func @transform_1(%arg0: i32) -> (i32, i32) {
    %c0_i32 = arith.constant 0 : i32
    %c0_i32_0 = arith.constant 0 : i32
    %c0_i32_1 = arith.constant 0 : i32
    return %c0_i32, %c0_i32_0 : i32, i32
  }
  func.func @transform_2(%arg0: i32) -> (i32, i32) {
    %c0_i32 = arith.constant 0 : i32
    %c0_i32_0 = arith.constant 0 : i32
    %c0_i32_1 = arith.constant 0 : i32
    return %c0_i32, %c0_i32_0 : i32, i32
  }
  func.func @transform_3(%arg0: i32) -> (i32, i32) {
    %c0_i32 = arith.constant 0 : i32
    %c0_i32_0 = arith.constant 0 : i32
    %c0_i32_1 = arith.constant 0 : i32
    return %c0_i32, %c0_i32_0 : i32, i32
  }
  func.func @transform_4(%arg0: i32) -> (i32, i32, i32) {
    %c0_i32 = arith.constant 0 : i32
    %c0_i32_0 = arith.constant 0 : i32
    %c0_i32_1 = arith.constant 0 : i32
    %c0_i32_2 = arith.constant 0 : i32
    return %c0_i32, %c0_i32_0, %c0_i32_1 : i32, i32, i32
  }
  func.func @transform_5(%arg0: i32) -> (i32, i32) {
    %c0_i32 = arith.constant 0 : i32
    %c0_i32_0 = arith.constant 0 : i32
    %c0_i32_1 = arith.constant 0 : i32
    return %c0_i32, %c0_i32_0 : i32, i32
  }
  func.func @transform_6(%arg0: i32) -> (i32, i32) {
    %c0_i32 = arith.constant 0 : i32
    %c0_i32_0 = arith.constant 0 : i32
    %c0_i32_1 = arith.constant 0 : i32
    return %c0_i32, %c0_i32_0 : i32, i32
  }
  func.func @transform_7(%arg0: i32) -> (i32, i32) {
    %c0_i32 = arith.constant 0 : i32
    %c0_i32_0 = arith.constant 0 : i32
    %c0_i32_1 = arith.constant 0 : i32
    return %c0_i32, %c0_i32_0 : i32, i32
  }
  func.func @transform_8(%arg0: i32) -> (i32, i32, i32) {
    %c0_i32 = arith.constant 0 : i32
    %c0_i32_0 = arith.constant 0 : i32
    %c0_i32_1 = arith.constant 0 : i32
    %c0_i32_2 = arith.constant 0 : i32
    return %c0_i32, %c0_i32_0, %c0_i32_1 : i32, i32, i32
  }
  func.func @transform_9(%arg0: i32) -> (i32, i32) {
    %c0_i32 = arith.constant 0 : i32
    %c0_i32_0 = arith.constant 0 : i32
    %c0_i32_1 = arith.constant 0 : i32
    return %c0_i32, %c0_i32_0 : i32, i32
  }
  func.func @transform_10(%arg0: i32) -> (i32, i32) {
    %c0_i32 = arith.constant 0 : i32
    %c0_i32_0 = arith.constant 0 : i32
    %c0_i32_1 = arith.constant 0 : i32
    return %c0_i32, %c0_i32_0 : i32, i32
  }
  func.func @transform_11(%arg0: i32) -> (i32, i32) {
    %c0_i32 = arith.constant 0 : i32
    %c0_i32_0 = arith.constant 0 : i32
    %c0_i32_1 = arith.constant 0 : i32
    return %c0_i32, %c0_i32_0 : i32, i32
  }
  func.func @transform_12(%arg0: i32) -> (i32, i32, i32) {
    %c0_i32 = arith.constant 0 : i32
    %c0_i32_0 = arith.constant 0 : i32
    %c0_i32_1 = arith.constant 0 : i32
    %c0_i32_2 = arith.constant 0 : i32
    return %c0_i32, %c0_i32_0, %c0_i32_1 : i32, i32, i32
  }
  func.func @transform_13(%arg0: i32) -> (i32, i32) {
    %c0_i32 = arith.constant 0 : i32
    %c0_i32_0 = arith.constant 0 : i32
    %c0_i32_1 = arith.constant 0 : i32
    return %c0_i32, %c0_i32_0 : i32, i32
  }
  func.func @transform_14(%arg0: i32) -> (i32, i32) {
    %c0_i32 = arith.constant 0 : i32
    %c0_i32_0 = arith.constant 0 : i32
    %c0_i32_1 = arith.constant 0 : i32
    return %c0_i32, %c0_i32_0 : i32, i32
  }
  func.func @transform_15(%arg0: i32) -> (i32, i32) {
    %c0_i32 = arith.constant 0 : i32
    %c0_i32_0 = arith.constant 0 : i32
    %c0_i32_1 = arith.constant 0 : i32
    return %c0_i32, %c0_i32_0 : i32, i32
  }
  func.func @transform_16(%arg0: i32) -> (i32, i32, i32) {
    %c0_i32 = arith.constant 0 : i32
    %c0_i32_0 = arith.constant 0 : i32
    %c0_i32_1 = arith.constant 0 : i32
    return %arg0, %c0_i32, %c0_i32_0 : i32, i32, i32
  }
}

</mosaic_0001>

<bundles_post_ra>
// kernel: dense_block_forward_nchw.1
= control target key start
LH: loop header
LB: loop body
LE: loop exit
PB: predicated region body
PF: predicated region fallthrough
CT: control target
= control target key end

     0   :  { %s4157_s21 = smov 0   ;;  %s4823_s0 = inlined_call_operand.vmem [shape: f32[2,4,256], index: 0, kind: input, shape index: {}]   ;;  %s4824_s1 = inlined_call_operand.vmem [shape: f32[2,256], index: 1, kind: input, shape index: {}]   ;;  %s4825_s2 = inlined_call_operand.vmem [shape: f32[4,4], index: 2, kind: input, shape index: {}]   ;;  %s4826_s3 = inlined_call_operand.vmem [shape: f32[4,1], index: 3, kind: input, shape index: {}]   ;;  %s4827_s4 = inlined_call_operand.vmem [shape: f32[9,4,4], index: 4, kind: input, shape index: {}]   ;;  %s4828_s5 = inlined_call_operand.vmem [shape: f32[4,1], index: 5, kind: input, shape index: {}]   ;;  %s4829_s6 = inlined_call_operand.vmem [shape: f32[8,8], index: 6, kind: input, shape index: {}]   ;;  %s4830_s7 = inlined_call_operand.vmem [shape: f32[8,1], index: 7, kind: input, shape index: {}]   ;;  %s4831_s8 = inlined_call_operand.vmem [shape: f32[9,4,8], index: 8, kind: input, shape index: {}]   ;;  %s4832_s9 = inlined_call_operand.vmem [shape: f32[4,1], index: 9, kind: input, shape index: {}]   ;;  %s4833_s10 = inlined_call_operand.vmem [shape: f32[12,12], index: 10, kind: input, shape index: {}]   ;;  %s4834_s11 = inlined_call_operand.vmem [shape: f32[12,1], index: 11, kind: input, shape index: {}]   ;;  %s4835_s12 = inlined_call_operand.vmem [shape: f32[9,4,12], index: 12, kind: input, shape index: {}]   ;;  %s4836_s13 = inlined_call_operand.vmem [shape: f32[4,1], index: 13, kind: input, shape index: {}]   ;;  %s4837_s14 = inlined_call_operand.vmem [shape: f32[4,16], index: 14, kind: input, shape index: {}]   ;;  %s4838_s15 = inlined_call_operand.vmem [shape: f32[4,1], index: 15, kind: input, shape index: {}]   ;;  %s4839_s16 = inlined_call_operand.vmem [shape: f32[2,4,256], index: 16, kind: output, shape index: {}]  }
   0x1   :  { %4851 = sst [smem:[#allocation2_spill]] %s4823_s0 }
   0x2 LB: > { %s3918_s22 = sadd.s32 4294967295, %s4057_s21   ;;  %p3922_p0 = scmp.ge.s32.totalorder %s4057_s21, 1  ;;  %s4057_s21 = sphi %s4157_s21, %s26_s21  }
   0x3   : > { %p462_p1 = scmp.lt.s32.totalorder %s4057_s21, 3 }
   0x5   : > { %p463_p2 = pnand %p3922_p0, %p462_p1 }
   0x6   : > { %p512_p3 = scmp.lt.s32.totalorder (!%p463_p2), %s3918_s22, 1  ;;  %s4061_s26 = smov (!%p463_p2), 1  }
   0x7   : > { %466 = sbr.rel (%p463_p2) target bundleno = 1922 (0x782), region = 84  ;;  %s4852_s29 = sld [smem:[#allocation2_spill]] (!%p463_p2) }
   0x8   : > { %s4062_s0 = smov (!%p463_p2), 17   ;;  %s4063_s19 = smov (!%p463_p2), 113  }
   0x9   : > { %s4843_s20 = smov (!%p463_p2), 16   ;;  %s4841_s23 = smov (!%p463_p2), 127  }
   0xa   : > { %s4845_s24 = smov (!%p463_p2), 112   ;;  %s4847_s27 = smov (!%p463_p2), 15  }
   0xb   : > { %s4849_s28 = smov (!%p463_p2), 111   ;;  %s4069_s17 = smov (!%p463_p2), 124  }
   0xc   : > { %v4059_v0 = vmov 0.0   ;;  %v525_v1 = vld [vmem:[%s4826_s3] sm:$0xf]  ;;  %s4860_s22 = smov (!%p512_p3, %s3918_s22), 1  ;;  %v4060_v2 = vmov 0   ;;  %vm537_vm0 = vcmask 1043456  }
   0xd   : > { %606 = vmatprep.mubr.f32.mxu0 %v4059_v0  ;;  %707 = vmatprep.mubr.f32.mxu1 %v4059_v0  ;;  %s4840_s25 = sshll.u32 %s4860_s22, 3  ;;  %v524_v5 = vld [vmem:[%s4825_s2] sm:$0xf]  ;;  %vm533_vm1 = vcmask 31744   ;;  %vm633_vm2 = vcmask 7168   ;;  %vm720_vm3 = vcmask 138240  }
   0xe   : > { %4048 = vset.pattern.permute.xlu0 %v4060_v2  ;;  %4049 = vset.pattern.permute.xlu1 %v4060_v2  ;;  %s516_s30 = scalar_lea.vmem %s4852_s29, %s4840_s25  ;;  %v4231_v13 = vld [vmem:[%s4829_s6] sm:$0xff]  ;;  %v618_v31 = vld [vmem:[%s4827_s4 + $0xc] sm:$0xf]  ;;  %vm807_vm4 = vcmask 924672   ;;  %v621_v41 = vld [vmem:[%s4827_s4 + $0x18] sm:$0xf] }
   0xf   : > { %528 = vperm.xlu0 %4048, %v525_v1   ;;  %627 = vrot.lane.b32.xlu1 %v4059_v0, %s4061_s26  ;;  %v4180_v3 = vld [vmem:[%s516_s30] sm:$0xff]  ;;  %v619_v42 = vld [vmem:[%s4827_s4 + $0x10] sm:$0xf]  ;;  %vm974_vm5 = vcmask 130048   ;;  %vm1150_vm6 = vcmask 1039360   ;;  %vm1061_vm7 = vcmask 916480  }
  0x10   : > { %v532_v4 = vcombine.high %v4180_v3, %v4180_v3  ;;  %v1452_v14 = vld [vmem:[%s4828_s5] sm:$0xf]  ;;  %v616_v46 = vld [vmem:[%s4827_s4 + $0x4] sm:$0xf]  ;;  %vm1237_vm8 = vcmask 121856   ;;  %vm1324_vm9 = vcmask 908288  }
  0x11   : > { %v1625_v15 = vld [vmem:[%s4830_s7] sm:$0xff]  ;;  %v622_v54 = vld [vmem:[%s4827_s4 + $0x1c] sm:$0xf]  ;;  %v620_v55 = vld [vmem:[%s4827_s4 + $0x14] sm:$0xf]  ;;  %v4354_v2 = vmax.f32 %v4180_v3, 0.0 }
  0x12   : > { %3927 = vmatprep.subr.msk.mxu0 %vm537_vm0, %v532_v4  ;;  %v615_v36 = vld [vmem:[%s4827_s4] sm:$0xf]  ;;  %v617_v59 = vld [vmem:[%s4827_s4 + $0x8] sm:$0xf]  ;;  %s4854_s29 = smov 127   ;;  %vm1654_vm10 = vcmask 64512  }
  0x13   : > { %714 = vrot.lane.b32.xlu0 %v4059_v0, %s4062_s0  ;;  %3928 = vmatpush1.msk.msra.mxu0 %vm537_vm0, %v4180_v3  ;;  %v623_v63 = vld [vmem:[%s4827_s4 + $0x20] sm:$0xf]  ;;  %v4358_v4 = vcombine.high %v4354_v2, %v4354_v2  ;;  %v1408_v3 = vlaneseq  ;;  %s4071_s30 = smov 116   ;;  %vm2713_vm11 = vcmask 97280  }
  0x14   : > { %3929 = vmatmul.mubr.msk.f32.vlgmr.msra.gmra.mxu0 %vm533_vm1, %v524_v5  ;;  %1148 = vrot.lane.b32.xlu1 %v4059_v0, %s4841_s23 }
  0x15   : > { %794 = vmatprep.mubr.f32.mxu0 %v4059_v0 }
  0x17   : > { %805 = vrot.lane.b32.xlu0 %v4059_v0, %s4063_s19 }
  0x1b   : > { %968 = vrot.lane.b32.xlu0 %v4059_v0, %s4843_s20 }
  0x1f   : > { %1059 = vrot.lane.b32.xlu0 %v4059_v0, %s4845_s24 }
  0x81   : > { %v4249_v18 = vpop.permute.xlu1 %627 }
  0x86   : > { %v4253_v20 = vpop.permute.xlu1 %1148 }
  0x8a   : > { %v529_v6 = vpop.permute.xlu0 %528 }
  0x8e   : > { %v4245_v16 = vpop.permute.xlu0 %714 }
  0x92   : > { %v4247_v17 = vpop.permute.xlu0 %805 }
  0x96   : > { %v4251_v19 = vpop.permute.xlu0 %968 }
  0x9a   : > { %v4255_v21 = vpop.permute.xlu0 %1059 }
  0xd4   : > { %v608_v7 = vpop.f32.mrf.mxu0 }
  0xd5   : > { %v609_v8 = vadd.f32 %v608_v7, %v529_v6 }
  0xd6   : > { %v610_v10 = vpop.f32.mrf.mxu0 }
  0xd7   : > { %v4202_v9 = vmax.f32 %v609_v8, 0.0  ;;  %v611_v11 = vadd.f32 %v610_v10, %v529_v6 }
  0xd9   : > { %801 = vrot.lane.b32.xlu1 %v4202_v9, %s4063_s19  ;;  %629 = vrot.lane.b32.xlu0 %v4202_v9, %s4061_s26  ;;  %v614_v12 = vmax.f32 %v611_v11, 0.0  ;;  %v1409_v11 = vshrl.u32 %v1408_v3, 7 }
  0xdd   : > { %1055 = vrot.lane.b32.xlu1 %v4202_v9, %s4845_s24  ;;  %716 = vrot.lane.b32.xlu0 %v4202_v9, %s4062_s0 }
  0xe1   : > { %1233 = vrot.lane.b32.xlu1 %v4202_v9, %s4847_s27  ;;  %970 = vrot.lane.b32.xlu0 %v4202_v9, %s4843_s20 }
  0xe5   : > { %631 = vrot.lane.b32.xlu1 %v614_v12, %s4061_s26  ;;  %1144 = vrot.lane.b32.xlu0 %v4202_v9, %s4841_s23 }
  0xe9   : > { %718 = vrot.lane.b32.xlu1 %v614_v12, %s4062_s0  ;;  %1146 = vrot.lane.b32.xlu0 %v614_v12, %s4841_s23  ;;  %s4853_s23 = smov 16  }
  0xed   : > { %803 = vrot.lane.b32.xlu1 %v614_v12, %s4063_s19  ;;  %1235 = vrot.lane.b32.xlu0 %v614_v12, %s4847_s27 }
  0xf1   : > { %972 = vrot.lane.b32.xlu1 %v614_v12, %s4843_s20  ;;  %1320 = vrot.lane.b32.xlu0 %v614_v12, %s4849_s28 }
  0xf5   : > { %1057 = vrot.lane.b32.xlu1 %v614_v12, %s4845_s24  ;;  %1318 = vrot.lane.b32.xlu0 %v4202_v9, %s4849_s28 }
  0xf9   : > { %1231 = vrot.lane.b32.xlu1 %v4059_v0, %s4847_s27  ;;  %1465 = vrot.lane.b32.xlu0 %v4231_v13, %s4069_s17 }
  0xfd   : > { %1322 = vrot.lane.b32.xlu1 %v4059_v0, %s4849_s28 }
 0x101   : > { %1455 = vperm.xlu1 %4049, %v1452_v14  }
 0x105   : > { %1628 = vperm.xlu1 %4049, %v1625_v15  }
 0x14b   : > { %v802_v22 = vpop.permute.xlu1 %801  ;;  %v630_v23 = vpop.permute.xlu0 %629 }
 0x14c   : > { %v634_v32 = vsel %vm633_vm2, %v4249_v18, %v630_v23 }
 0x14f   : > { %v1056_v24 = vpop.permute.xlu1 %1055  ;;  %v717_v25 = vpop.permute.xlu0 %716 }
 0x150   : > { %v721_v37 = vsel %vm720_vm3, %v4245_v16, %v717_v25 }
 0x153   : > { %v4257_v26 = vpop.permute.xlu1 %1233  ;;  %v971_v27 = vpop.permute.xlu0 %970 }
 0x154   : > { %v975_v47 = vsel %vm974_vm5, %v4251_v19, %v971_v27 }
 0x157   : > { %v632_v28 = vpop.permute.xlu1 %631  ;;  %v1145_v29 = vpop.permute.xlu0 %1144 }
 0x158   : > { %v635_v30 = vsel %vm633_vm2, %v630_v23, %v632_v28  ;;  %v522_v23 = vld [vmem:[%s4824_s1] sm:$0xf] }
 0x159   : > { %3930 = vmatprep.subr.msk.mxu1 %vm537_vm0, %v635_v30 }
 0x15a   : > { %3931 = vmatpush1.msk.msra.mxu1 %vm537_vm0, %v634_v32 }
 0x15b   : > { %v719_v33 = vpop.permute.xlu1 %718  ;;  %3932 = vmatmul.mubr.msk.f32.vlgmr.msra.gmra.mxu1 %vm533_vm1, %v618_v31  ;;  %v1147_v35 = vpop.permute.xlu0 %1146 }
 0x15c   : > { %v722_v34 = vsel %vm720_vm3, %v717_v25, %v719_v33  ;;  %881 = vmatprep.mubr.f32.mxu1 %v4059_v0  ;;  %v1152_v48 = vsel %vm1150_vm6, %v1147_v35, %v4253_v20  ;;  %v1151_v49 = vsel %vm1150_vm6, %v1145_v29, %v1147_v35 }
 0x15d   : > { %3933 = vmatprep.subr.msk.mxu0 %vm537_vm0, %v722_v34 }
 0x15e   : > { %3934 = vmatpush1.msk.msra.mxu0 %vm537_vm0, %v721_v37 }
 0x15f   : > { %v804_v38 = vpop.permute.xlu1 %803  ;;  %3939 = vmatprep.subr.msk.mxu0 %vm537_vm0, %v614_v12  ;;  %3935 = vmatmul.mubr.msk.f32.vlgmr.msra.gmra.mxu0 %vm533_vm1, %v615_v36  ;;  %v1236_v43 = vpop.permute.xlu0 %1235 }
 0x160   : > { %v808_v39 = vsel %vm807_vm4, %v802_v22, %v804_v38  ;;  %v809_v40 = vsel %vm807_vm4, %v804_v38, %v4247_v17  ;;  %3940 = vmatpush1.msk.msra.mxu0 %vm537_vm0, %v4202_v9  ;;  %961 = vmatprep.mubr.f32.mxu0 %v4059_v0  ;;  %v1239_v56 = vsel %vm1237_vm8, %v4257_v26, %v1236_v43  ;;  %v1410_v22 = vsub.s32 0, %v1409_v11 }
 0x161   : > { %3936 = vmatprep.subr.msk.mxu1 %vm537_vm0, %v809_v40 }
 0x162   : > { %3937 = vmatpush1.msk.msra.mxu1 %vm537_vm0, %v808_v39  ;;  %v1411_v29 = vrot.slane %v522_v23, %v1410_v22 }
 0x163   : > { %v973_v44 = vpop.permute.xlu1 %972  ;;  %3938 = vmatmul.mubr.msk.f32.vlgmr.msra.gmra.mxu1 %vm533_vm1, %v621_v41  ;;  %3941 = vmatmul.mubr.msk.f32.vlgmr.msra.gmra.mxu0 %vm533_vm1, %v619_v42  ;;  %v1321_v51 = vpop.permute.xlu0 %1320 }
 0x164   : > { %v976_v45 = vsel %vm974_vm5, %v971_v27, %v973_v44  ;;  %1048 = vmatprep.mubr.f32.mxu1 %v4059_v0  ;;  %1135 = vmatprep.mubr.f32.mxu0 %v4059_v0  ;;  %v1436_v27 = vsub.s32 3, %v1409_v11  ;;  %v4370_v39 = vrot.slane %v1411_v29, %v1410_v22  ;;  %v4431_v29 = vld [vmem:[%s4833_s10 + $0x8] sm:$0xf] }
 0x165   : > { %3942 = vmatprep.subr.msk.mxu1 %vm537_vm0, %v976_v45 }
 0x166   : > { %3943 = vmatpush1.msk.msra.mxu1 %vm537_vm0, %v975_v47  ;;  %v1437_v37 = vrot.slane %v522_v23, %v1436_v27  ;;  %v2391_v27 = vld [vmem:[%s4832_s9] sm:$0xf] }
 0x167   : > { %v1058_v50 = vpop.permute.xlu1 %1057  ;;  %3944 = vmatmul.mubr.msk.f32.vlgmr.msra.gmra.mxu1 %vm533_vm1, %v616_v46  ;;  %3948 = vmatprep.subr.msk.mxu1 %vm537_vm0, %v1152_v48  ;;  %v1319_v60 = vpop.permute.xlu0 %1318 }
 0x168   : > { %v1062_v52 = vsel %vm1061_vm7, %v1056_v24, %v1058_v50  ;;  %v1063_v53 = vsel %vm1061_vm7, %v1058_v50, %v4255_v21  ;;  %3949 = vmatpush1.msk.msra.mxu1 %vm537_vm0, %v1151_v49  ;;  %1224 = vmatprep.mubr.f32.mxu1 %v4059_v0  ;;  %v1325_v1 = vsel %vm1324_vm9, %v1319_v60, %v1321_v51  ;;  %v1414_v24 = vsub.s32 2, %v1409_v11 }
 0x169   : > { %3945 = vmatprep.subr.msk.mxu0 %vm537_vm0, %v1063_v53 }
 0x16a   : > { %3946 = vmatpush1.msk.msra.mxu0 %vm537_vm0, %v1062_v52  ;;  %v1415_v30 = vrot.slane %v522_v23, %v1414_v24 }
 0x16b   : > { %v4325_v57 = vpop.permute.xlu1 %1231  ;;  %3947 = vmatmul.mubr.msk.f32.vlgmr.msra.gmra.mxu0 %vm533_vm1, %v622_v54  ;;  %3951 = vmatprep.subr.msk.mxu0 %vm537_vm0, %v1239_v56 }
 0x16c   : > { %3950 = vmatmul.mubr.msk.f32.vlgmr.msra.gmra.mxu1 %vm533_vm1, %v620_v55  ;;  %v1238_v58 = vsel %vm1237_vm8, %v4325_v57, %v4257_v26  ;;  %1311 = vmatprep.mubr.f32.mxu0 %v4059_v0  ;;  %v4372_v40 = vrot.slane %v1415_v30, %v1410_v22  ;;  %v2667_v30 = vld [vmem:[%s4834_s11 + $0x8] sm:$0xf] }
 0x16d   : > { %3952 = vmatpush1.msk.msra.mxu0 %vm537_vm0, %v1238_v58  ;;  %1398 = vmatprep.mubr.f32.mxu1 %v4059_v0 }
 0x16f   : > { %v4339_v61 = vpop.permute.xlu1 %1322  ;;  %3953 = vmatmul.mubr.msk.f32.vlgmr.msra.gmra.mxu0 %vm533_vm1, %v617_v59 }
 0x170   : > { %v1326_v62 = vsel %vm1324_vm9, %v1321_v51, %v4339_v61  ;;  %1539 = vmatprep.mubr.f32.mxu0 %v4059_v0 }
 0x171   : > { %3954 = vmatprep.subr.msk.mxu1 %vm537_vm0, %v1326_v62 }
 0x172   : > { %3955 = vmatpush1.msk.msra.mxu1 %vm537_vm0, %v1325_v1 }
 0x173   : > { %3956 = vmatmul.mubr.msk.f32.vlgmr.msra.gmra.mxu1 %vm533_vm1, %v623_v63  ;;  %3960 = vmatprep.subr.msk.mxu1 %vm537_vm0, %v4358_v4 }
 0x174   : > { %1618 = vmatprep.mubr.f32.mxu1 %v4059_v0  ;;  %3961 = vmatpush1.msk.msra.mxu1 %vm537_vm0, %v4354_v2 }
 0x177   : > { %3962 = vmatmul.mubr.msk.f32.vlgmr.msra.gmra.mxu1 %vm533_vm1, %v4231_v13  ;;  %v1432_v13 = vsub.s32 1, %v1409_v11 }
 0x178   : > { %1804 = vmatprep.mubr.f32.mxu1 %v4059_v0 }
 0x179   : > { %v1433_v33 = vrot.slane %v522_v23, %v1432_v13  ;;  %v4376_v49 = vrot.slane %v1437_v37, %v1432_v13 }
 0x17b   : > { %v4374_v43 = vrot.slane %v1433_v33, %v1432_v13 }
 0x17c   : > { %v1456_v1 = vpop.permute.xlu1 %1455 }
 0x21b   : > { %v709_v5 = vpop.f32.mrf.mxu1 }
 0x21d   : > { %v711_v6 = vpop.f32.mrf.mxu1 }
 0x21f   : > { %v796_v7 = vpop.f32.mrf.mxu0 }
 0x220   : > { %v797_v28 = vadd.f32 %v796_v7, %v709_v5 }
 0x221   : > { %v798_v8 = vpop.f32.mrf.mxu0 }
 0x222   : > { %v799_v34 = vadd.f32 %v798_v8, %v711_v6 }
 0x223   : > { %v883_v9 = vpop.f32.mrf.mxu1  ;;  %v963_v10 = vpop.f32.mrf.mxu0 }
 0x224   : > { %v888_v38 = vadd.f32 %v883_v9, %v797_v28  ;;  %v1466_v9 = vpop.permute.xlu0 %1465  ;;  %v4424_v28 = vld [vmem:[%s4833_s10] sm:$0xff] }
 0x225   : > { %v885_v12 = vpop.f32.mrf.mxu1  ;;  %v965_v15 = vpop.f32.mrf.mxu0 }
 0x226   : > { %v889_v44 = vadd.f32 %v885_v12, %v799_v34  ;;  %v1426_v50 = vmul.f32 %v4370_v39, %v888_v38 }
 0x227   : > { %v1050_v14 = vpop.f32.mrf.mxu1 }
 0x228   : > { %v1051_v35 = vadd.f32 %v1050_v14, %v963_v10  ;;  %v1427_v55 = vmul.f32 %v4372_v40, %v889_v44  ;;  %v1629_v14 = vpop.permute.xlu1 %1628 }
 0x229   : > { %v1052_v25 = vpop.f32.mrf.mxu1 }
 0x22a   : > { %v1053_v45 = vadd.f32 %v1052_v25, %v965_v15 }
 0x22b   : > { %v1137_v26 = vpop.f32.mrf.mxu0 }
 0x22c   : > { %v1226_v32 = vpop.f32.mrf.mxu1  ;;  %v1142_v46 = vadd.f32 %v1137_v26, %v1051_v35 }
 0x22d   : > { %v1139_v31 = vpop.f32.mrf.mxu0 }
 0x22e   : > { %v1228_v41 = vpop.f32.mrf.mxu1  ;;  %v1143_v51 = vadd.f32 %v1139_v31, %v1053_v45  ;;  %v1428_v56 = vadd.f32 %v1426_v50, %v1142_v46  ;;  %v2666_v31 = vld [vmem:[%s4834_s11] sm:$0xff] }
 0x22f   : > { %v1313_v36 = vpop.f32.mrf.mxu0  ;;  %v1635_v50 = vld [vmem:[%s4831_s8] sm:$0xf] }
 0x230   : > { %v1314_v47 = vadd.f32 %v1313_v36, %v1226_v32  ;;  %v1429_v60 = vadd.f32 %v1427_v55, %v1143_v51  ;;  %v1641_v51 = vld [vmem:[%s4831_s8 + $0x18] sm:$0xf] }
 0x231   : > { %v1315_v42 = vpop.f32.mrf.mxu0 }
 0x232   : > { %v1316_v52 = vadd.f32 %v1315_v42, %v1228_v41  ;;  %v1638_v41 = vld [vmem:[%s4831_s8 + $0xc] sm:$0xf] }
 0x233   : > { %v1400_v48 = vpop.f32.mrf.mxu1 }
 0x234   : > { %v1405_v53 = vadd.f32 %v1400_v48, %v1314_v47 }
 0x235   : > { %v1402_v54 = vpop.f32.mrf.mxu1 }
 0x236   : > { %v1448_v58 = vmul.f32 %v4374_v43, %v1405_v53  ;;  %v1406_v59 = vadd.f32 %v1402_v54, %v1316_v52 }
 0x237   : > { %v1620_v10 = vpop.f32.mrf.mxu1 }
 0x238   : > { %v1449_v62 = vmul.f32 %v4376_v49, %v1406_v59  ;;  %v1450_v63 = vadd.f32 %v1448_v58, %v1428_v56  ;;  %v1639_v56 = vld [vmem:[%s4831_s8 + $0x10] sm:$0xf]  ;;  %v1636_v58 = vld [vmem:[%s4831_s8 + $0x4] sm:$0xf] }
 0x239   : > { %v1622_v23 = vpop.f32.mrf.mxu1 }
 0x23a   : > { %v1451_v5 = vadd.f32 %v1449_v62, %v1429_v60  ;;  %v1458_v6 = vadd.f32 %v1456_v1, %v1450_v63 }
 0x23c   : > { %v1459_v7 = vadd.f32 %v1456_v1, %v1451_v5  ;;  %v4384_v8 = vmax.f32 %v1458_v6, 0.0  ;;  %v1642_v5 = vld [vmem:[%s4831_s8 + $0x1c] sm:$0xf] }
 0x23e   : > { %v4382_v3 = vmax.f32 %v1459_v7, 0.0 }
 0x240   : > { %3957 = vmatprep.subr.msk.mxu0 %vm537_vm0, %v4382_v3 }
 0x241   : > { %3958 = vmatpush1.msk.msra.mxu0 %vm537_vm0, %v4384_v8 }
 0x242   : > { %3959 = vmatmul.mubr.msk.f32.vlgmr.msra.gmra.mxu0 %vm533_vm1, %v1466_v9 }
 0x243   : > { %1722 = vmatprep.mubr.f32.mxu0 %v4059_v0 }
 0x302   : > { %v1541_v11 = vpop.f32.mrf.mxu0 }
 0x303   : > { %v1621_v12 = vadd.f32 %v1620_v10, %v1541_v11 }
 0x304   : > { %v1543_v15 = vpop.f32.mrf.mxu0 }
 0x305   : > { %v1631_v22 = vadd.f32 %v1629_v14, %v1621_v12  ;;  %v1623_v13 = vadd.f32 %v1622_v23, %v1543_v15  ;;  %v1640_v12 = vld [vmem:[%s4831_s8 + $0x14] sm:$0xf] }
 0x307   : > { %v4392_v24 = vmax.f32 %v1631_v22, 0.0  ;;  %v1632_v25 = vadd.f32 %v1629_v14, %v1623_v13  ;;  %v1637_v14 = vld [vmem:[%s4831_s8 + $0x8] sm:$0xf] }
 0x309   : > { %1811 = vrot.lane.b32.xlu1 %v4392_v24, %s4063_s19  ;;  %1646 = vrot.lane.b32.xlu0 %v4392_v24, %s4061_s26  ;;  %v1634_v26 = vmax.f32 %v1632_v25, 0.0  ;;  %v1643_v25 = vld [vmem:[%s4831_s8 + $0x20] sm:$0xf] }
 0x30d   : > { %2051 = vrot.lane.b32.xlu1 %v4392_v24, %s4845_s24  ;;  %1729 = vrot.lane.b32.xlu0 %v4392_v24, %s4062_s0 }
 0x311   : > { %1969 = vrot.lane.b32.xlu0 %v4392_v24, %s4853_s23  ;;  %1648 = vrot.lane.b32.xlu1 %v1634_v26, %s4061_s26 }
 0x315   : > { %1813 = vrot.lane.b32.xlu0 %v1634_v26, %s4063_s19  ;;  %1731 = vrot.lane.b32.xlu1 %v1634_v26, %s4062_s0 }
 0x319   : > { %2217 = vrot.lane.b32.xlu0 %v4392_v24, %s4847_s27  ;;  %1971 = vrot.lane.b32.xlu1 %v1634_v26, %s4853_s23 }
 0x31d   : > { %2053 = vrot.lane.b32.xlu0 %v1634_v26, %s4845_s24  ;;  %2135 = vrot.lane.b32.xlu1 %v4392_v24, %s4854_s29  ;;  %s4855_s24 = smov 112  }
 0x321   : > { %2137 = vrot.lane.b32.xlu0 %v1634_v26, %s4854_s29  ;;  %2219 = vrot.lane.b32.xlu1 %v1634_v26, %s4847_s27  ;;  %s4856_s27 = smov 15  }
 0x325   : > { %2301 = vrot.lane.b32.xlu0 %v1634_v26, %s4849_s28  ;;  %2299 = vrot.lane.b32.xlu1 %v4392_v24, %s4849_s28  ;;  %s4070_s28 = smov 120  }
 0x329   : > { %2394 = vperm.xlu0 %4048, %v2391_v27   ;;  %2405 = vrot.lane.b32.xlu1 %v4424_v28, %s4069_s17 }
 0x32d   : > { %2407 = vrot.lane.b32.xlu0 %v4431_v29, %s4069_s17  ;;  %2571 = vrot.lane.b32.xlu1 %v4424_v28, %s4070_s28 }
 0x331   : > { %2573 = vrot.lane.b32.xlu0 %v4431_v29, %s4070_s28  ;;  %2675 = vperm.xlu1 %4049, %v2667_v30  }
 0x335   : > { %2670 = vperm.xlu0 %4048, %v2666_v31  }
 0x37b   : > { %v1812_v32 = vpop.permute.xlu1 %1811  ;;  %v1647_v33 = vpop.permute.xlu0 %1646 }
 0x37c   : > { %v1650_v42 = vsel %vm633_vm2, %v4249_v18, %v1647_v33 }
 0x37f   : > { %v2052_v34 = vpop.permute.xlu1 %2051  ;;  %v1730_v35 = vpop.permute.xlu0 %1729 }
 0x380   : > { %v1733_v52 = vsel %vm720_vm3, %v4245_v16, %v1730_v35 }
 0x383   : > { %v1970_v36 = vpop.permute.xlu0 %1969  ;;  %v1649_v37 = vpop.permute.xlu1 %1648 }
 0x384   : > { %v1651_v38 = vsel %vm633_vm2, %v1647_v33, %v1649_v37  ;;  %v1973_v59 = vsel %vm974_vm5, %v4251_v19, %v1970_v36 }
 0x385   : > { %1688 = vmatprep.subr.mxu0 %v1651_v38 }
 0x386   : > { %1689 = vmatpush1.msra.mxu0 %v1650_v42 }
 0x387   : > { %v1814_v44 = vpop.permute.xlu0 %1813  ;;  %3963 = vmatmul.mubr.msk.f32.vlgmr.msra.gmra.mxu0 %vm1654_vm10, %v1638_v41  ;;  %v1732_v45 = vpop.permute.xlu1 %1731 }
 0x388   : > { %v1815_v46 = vsel %vm807_vm4, %v1812_v32, %v1814_v44  ;;  %v1734_v47 = vsel %vm720_vm3, %v1730_v35, %v1732_v45  ;;  %v1816_v48 = vsel %vm807_vm4, %v1814_v44, %v4247_v17  ;;  %1886 = vmatprep.mubr.f32.mxu0 %v4059_v0 }
 0x389   : > { %1770 = vmatprep.subr.mxu1 %v1734_v47  ;;  %1852 = vmatprep.subr.mxu0 %v1816_v48 }
 0x38a   : > { %1771 = vmatpush1.msra.mxu1 %v1733_v52  ;;  %1853 = vmatpush1.msra.mxu0 %v1815_v46 }
 0x38b   : > { %v2218_v53 = vpop.permute.xlu0 %2217  ;;  %3964 = vmatmul.mubr.msk.f32.vlgmr.msra.gmra.mxu1 %vm1654_vm10, %v1635_v50  ;;  %3965 = vmatmul.mubr.msk.f32.vlgmr.msra.gmra.mxu0 %vm1654_vm10, %v1641_v51  ;;  %v1972_v54 = vpop.permute.xlu1 %1971 }
 0x38c   : > { %1928 = vmatprep.subr.mxu1 %v1634_v26  ;;  %v1974_v55 = vsel %vm974_vm5, %v1970_v36, %v1972_v54  ;;  %1962 = vmatprep.mubr.f32.mxu1 %v4059_v0  ;;  %v2221_v15 = vsel %vm1237_vm8, %v4325_v57, %v2218_v53 }
 0x38d   : > { %1929 = vmatpush1.msra.mxu1 %v4392_v24  ;;  %2010 = vmatprep.subr.mxu0 %v1974_v55 }
 0x38e   : > { %2011 = vmatpush1.msra.mxu0 %v1973_v59  ;;  %2044 = vmatprep.mubr.f32.mxu0 %v4059_v0 }
 0x38f   : > { %v2054_v60 = vpop.permute.xlu0 %2053  ;;  %3966 = vmatmul.mubr.msk.f32.vlgmr.msra.gmra.mxu1 %vm1654_vm10, %v1639_v56  ;;  %3967 = vmatmul.mubr.msk.f32.vlgmr.msra.gmra.mxu0 %vm1654_vm10, %v1636_v58  ;;  %v2136_v62 = vpop.permute.xlu1 %2135 }
 0x390   : > { %v2055_v63 = vsel %vm1061_vm7, %v2052_v34, %v2054_v60  ;;  %v2056_v1 = vsel %vm1061_vm7, %v2054_v60, %v4255_v21  ;;  %2126 = vmatprep.mubr.f32.mxu1 %v4059_v0  ;;  %2210 = vmatprep.mubr.f32.mxu0 %v4059_v0 }
 0x391   : > { %2092 = vmatprep.subr.mxu1 %v2056_v1 }
 0x392   : > { %2093 = vmatpush1.msra.mxu1 %v2055_v63 }
 0x393   : > { %v2138_v6 = vpop.permute.xlu0 %2137  ;;  %3968 = vmatmul.mubr.msk.f32.vlgmr.msra.gmra.mxu1 %vm1654_vm10, %v1642_v5  ;;  %v2220_v7 = vpop.permute.xlu1 %2219 }
 0x394   : > { %v2139_v9 = vsel %vm1150_vm6, %v2136_v62, %v2138_v6  ;;  %v2140_v10 = vsel %vm1150_vm6, %v2138_v6, %v4253_v20  ;;  %v2222_v11 = vsel %vm1237_vm8, %v2218_v53, %v2220_v7  ;;  %2292 = vmatprep.mubr.f32.mxu1 %v4059_v0 }
 0x395   : > { %2176 = vmatprep.subr.mxu0 %v2140_v10  ;;  %2258 = vmatprep.subr.mxu1 %v2222_v11 }
 0x396   : > { %2177 = vmatpush1.msra.mxu0 %v2139_v9  ;;  %2259 = vmatpush1.msra.mxu1 %v2221_v15 }
 0x397   : > { %v2302_v22 = vpop.permute.xlu0 %2301  ;;  %3969 = vmatmul.mubr.msk.f32.vlgmr.msra.gmra.mxu0 %vm1654_vm10, %v1640_v12  ;;  %3970 = vmatmul.mubr.msk.f32.vlgmr.msra.gmra.mxu1 %vm1654_vm10, %v1637_v14  ;;  %v2300_v23 = vpop.permute.xlu1 %2299 }
 0x398   : > { %3972 = vmatprep.subr.msk.mxu1 %vm537_vm0, %v4382_v3  ;;  %v2303_v24 = vsel %vm1324_vm9, %v2300_v23, %v2302_v22  ;;  %v2304_v13 = vsel %vm1324_vm9, %v2302_v22, %v4339_v61  ;;  %2374 = vmatprep.mubr.f32.mxu0 %v4059_v0 }
 0x399   : > { %3973 = vmatpush1.msk.msra.mxu1 %vm537_vm0, %v4384_v8  ;;  %2340 = vmatprep.subr.mxu0 %v2304_v13 }
 0x39a   : > { %2341 = vmatpush1.msra.mxu0 %v2303_v24  ;;  %2477 = vmatprep.mubr.f32.mxu1 %v4059_v0 }
 0x39b   : > { %3971 = vmatmul.mubr.msk.f32.vlgmr.msra.gmra.mxu0 %vm1654_vm10, %v1643_v25  ;;  %v2406_v26 = vpop.permute.xlu1 %2405  ;;  %3976 = vmatprep.subr.msk.mxu0 %vm537_vm0, %v4358_v4 }
 0x39c   : > { %3974 = vmatmul.mubr.msk.f32.vlgmr.msra.gmra.mxu1 %vm533_vm1, %v2406_v26  ;;  %3977 = vmatpush1.msk.msra.mxu0 %vm537_vm0, %v4354_v2 }
 0x39d   : > { %2558 = vmatprep.mubr.f32.mxu0 %v4059_v0  ;;  %2483 = vmatprep.mubr.f32.mxu1 %v4059_v0 }
 0x39f   : > { %3978 = vmatmul.mubr.msk.f32.vlgmr.msra.gmra.mxu0 %vm533_vm1, %v4424_v28  ;;  %v2572_v13 = vpop.permute.xlu1 %2571 }
 0x3a0   : > { %2564 = vmatprep.mubr.f32.mxu0 %v4059_v0 }
 0x3a3   : > { %3979 = vmatmul.mubr.msk.f32.gmra.mxu0 %vm533_vm1, %v4431_v29 }
 0x3a4   : > { %v2395_v27 = vpop.permute.xlu0 %2394  ;;  %2785 = vmatprep.mubr.f32.mxu0 %v4059_v0 }
 0x3a8   : > { %v2408_v30 = vpop.permute.xlu0 %2407 }
 0x3a9   : > { %3975 = vmatmul.mubr.msk.f32.gmra.mxu1 %vm533_vm1, %v2408_v30 }
 0x3aa   : > { %2649 = vmatprep.mubr.f32.mxu1 %v4059_v0 }
 0x3ac   : > { %v2574_v25 = vpop.permute.xlu0 %2573 }
 0x447   : > { %v1724_v31 = vpop.f32.mrf.mxu0 }
 0x449   : > { %v1726_v32 = vpop.f32.mrf.mxu0 }
 0x44b   : > { %v1806_v33 = vpop.f32.mrf.mxu1  ;;  %v1888_v34 = vpop.f32.mrf.mxu0 }
 0x44c   : > { %v1807_v42 = vadd.f32 %v1806_v33, %v1724_v31 }
 0x44d   : > { %v1808_v35 = vpop.f32.mrf.mxu1  ;;  %v1890_v36 = vpop.f32.mrf.mxu0 }
 0x44e   : > { %v1809_v45 = vadd.f32 %v1808_v35, %v1726_v32  ;;  %v1893_v50 = vadd.f32 %v1888_v34, %v1807_v42 }
 0x44f   : > { %v1964_v28 = vpop.f32.mrf.mxu1  ;;  %v2046_v37 = vpop.f32.mrf.mxu0 }
 0x450   : > { %v2047_v46 = vadd.f32 %v2046_v37, %v1964_v28  ;;  %v1894_v53 = vadd.f32 %v1890_v36, %v1809_v45  ;;  %v2383_v59 = vmul.f32 %v1893_v50, %v4370_v39  ;;  %v2671_v28 = vpop.permute.xlu0 %2670 }
 0x451   : > { %v1966_v38 = vpop.f32.mrf.mxu1  ;;  %v2048_v29 = vpop.f32.mrf.mxu0 }
 0x452   : > { %v2049_v54 = vadd.f32 %v2048_v29, %v1966_v38  ;;  %v2384_v5 = vmul.f32 %v1894_v53, %v4372_v40 }
 0x453   : > { %v2128_v41 = vpop.f32.mrf.mxu1 }
 0x454   : > { %v2133_v55 = vadd.f32 %v2128_v41, %v2047_v46 }
 0x455   : > { %v2130_v44 = vpop.f32.mrf.mxu1 }
 0x456   : > { %v2134_v60 = vadd.f32 %v2130_v44, %v2049_v54  ;;  %v2385_v6 = vadd.f32 %v2383_v59, %v2133_v55 }
 0x457   : > { %v2212_v47 = vpop.f32.mrf.mxu0  ;;  %v2294_v48 = vpop.f32.mrf.mxu1 }
 0x458   : > { %v2295_v56 = vadd.f32 %v2294_v48, %v2212_v47  ;;  %v2386_v10 = vadd.f32 %v2384_v5, %v2134_v60 }
 0x459   : > { %v2214_v51 = vpop.f32.mrf.mxu0  ;;  %v2296_v52 = vpop.f32.mrf.mxu1 }
 0x45a   : > { %v2297_v62 = vadd.f32 %v2296_v52, %v2214_v51  ;;  %v2676_v51 = vpop.permute.xlu1 %2675 }
 0x45b   : > { %v2376_v58 = vpop.f32.mrf.mxu0 }
 0x45c   : > { %v2381_v63 = vadd.f32 %v2376_v58, %v2295_v56  ;;  %v2479_v26 = vpop.f32.mrf.mxu1 }
 0x45d   : > { %v2378_v1 = vpop.f32.mrf.mxu0 }
 0x45e   : > { %v2387_v7 = vmul.f32 %v2381_v63, %v4374_v43  ;;  %v2382_v9 = vadd.f32 %v2378_v1, %v2297_v62  ;;  %v4628_v62 = vld [vmem:[%s4837_s14] sm:$0xf] }
 0x45f   : > { %v2560_v31 = vpop.f32.mrf.mxu0  ;;  %v3528_v63 = vld [vmem:[%s4836_s13] sm:$0xf] }
 0x460   : > { %v2389_v11 = vadd.f32 %v2387_v7, %v2385_v6  ;;  %v2388_v12 = vmul.f32 %v2382_v9, %v4376_v49  ;;  %v2561_v33 = vadd.f32 %v2560_v31, %v2479_v26  ;;  %v3539_v1 = vld [vmem:[%s4838_s15] sm:$0xf] }
 0x461   : > { %v2562_v34 = vpop.f32.mrf.mxu0 }
 0x462   : > { %v2390_v14 = vadd.f32 %v2388_v12, %v2386_v10  ;;  %v4537_v15 = vadd.f32 %v2395_v27, %v2389_v11 }
 0x463   : > { %v2566_v46 = vpop.f32.mrf.mxu0 }
 0x464   : > { %v4539_v22 = vadd.f32 %v2395_v27, %v2390_v14  ;;  %v2399_v24 = vmax.f32 %v4537_v15, 0.0  ;;  %v2481_v27 = vpop.f32.mrf.mxu1 }
 0x465   : > { %v2563_v38 = vadd.f32 %v2562_v34, %v2481_v27  ;;  %v2568_v54 = vpop.f32.mrf.mxu0 }
 0x466   : > { %v2400_v23 = vmax.f32 %v4539_v22, 0.0 }
 0x468   : > { %3980 = vmatprep.subr.msk.mxu1 %vm537_vm0, %v2400_v23 }
 0x469   : > { %3981 = vmatpush1.msk.msra.mxu1 %vm537_vm0, %v2399_v24  ;;  %v2485_v30 = vpop.f32.mrf.mxu1 }
 0x46a   : > { %3982 = vmatmul.mubr.msk.f32.vlgmr.msra.gmra.mxu1 %vm533_vm1, %v2572_v13  ;;  %v2567_v48 = vadd.f32 %v2566_v46, %v2485_v30 }
 0x46b   : > { %2655 = vmatprep.mubr.f32.mxu1 %v4059_v0  ;;  %v2487_v32 = vpop.f32.mrf.mxu1 }
 0x46c   : > { %v2569_v56 = vadd.f32 %v2568_v54, %v2487_v32 }
 0x46e   : > { %3983 = vmatmul.mubr.msk.f32.gmra.mxu1 %vm533_vm1, %v2574_v25 }
 0x46f   : > { %2969 = vmatprep.mubr.f32.mxu1 %v4059_v0 }
 0x52a   : > { %v2651_v35 = vpop.f32.mrf.mxu1 }
 0x52b   : > { %v2662_v36 = vadd.f32 %v2651_v35, %v2561_v33 }
 0x52c   : > { %v2653_v37 = vpop.f32.mrf.mxu1 }
 0x52d   : > { %v2678_v41 = vadd.f32 %v2671_v28, %v2662_v36  ;;  %v2663_v29 = vadd.f32 %v2653_v37, %v2563_v38 }
 0x52e   : > { %v2657_v47 = vpop.f32.mrf.mxu1 }
 0x52f   : > { %v4553_v42 = vmax.f32 %v2678_v41, 0.0  ;;  %v2679_v44 = vadd.f32 %v2671_v28, %v2663_v29  ;;  %v2664_v50 = vadd.f32 %v2657_v47, %v2567_v48  ;;  %v2689_v29 = vld [vmem:[%s4835_s12 + $0xc] sm:$0xf] }
 0x530   : > { %v2659_v55 = vpop.f32.mrf.mxu1 }
 0x531   : > { %2884 = vrot.lane.b32.xlu0 %v4553_v42, %s4063_s19  ;;  %2699 = vrot.lane.b32.xlu1 %v4553_v42, %s4061_s26  ;;  %v4563_v45 = vmax.f32 %v2679_v44, 0.0  ;;  %v2680_v52 = vadd.f32 %v2676_v51, %v2664_v50  ;;  %v2665_v58 = vadd.f32 %v2659_v55, %v2569_v56  ;;  %v2686_v55 = vld [vmem:[%s4835_s12] sm:$0xf] }
 0x533   : > { %v4577_v53 = vmax.f32 %v2680_v52, 0.0  ;;  %v2681_v59 = vadd.f32 %v2676_v51, %v2665_v58 }
 0x535   : > { %3242 = vrot.lane.b32.xlu0 %v4553_v42, %s4854_s29  ;;  %2792 = vrot.lane.b32.xlu1 %v4553_v42, %s4062_s0  ;;  %v4595_v60 = vmax.f32 %v2681_v59, 0.0  ;;  %v2692_v59 = vld [vmem:[%s4835_s12 + $0x18] sm:$0xf] }
 0x539   : > { %3056 = vrot.lane.b32.xlu1 %v4553_v42, %s4853_s23  ;;  %2701 = vrot.lane.b32.xlu0 %v4563_v45, %s4061_s26 }
 0x53d   : > { %3148 = vrot.lane.b32.xlu1 %v4553_v42, %s4855_s24  ;;  %2794 = vrot.lane.b32.xlu0 %v4563_v45, %s4062_s0 }
 0x541   : > { %3334 = vrot.lane.b32.xlu1 %v4553_v42, %s4856_s27  ;;  %3058 = vrot.lane.b32.xlu0 %v4563_v45, %s4853_s23 }
 0x545   : > { %2886 = vrot.lane.b32.xlu1 %v4563_v45, %s4063_s19  ;;  %2888 = vrot.lane.b32.xlu0 %v4577_v53, %s4063_s19 }
 0x549   : > { %3150 = vrot.lane.b32.xlu1 %v4563_v45, %s4855_s24  ;;  %3152 = vrot.lane.b32.xlu0 %v4577_v53, %s4855_s24 }
 0x54d   : > { %3244 = vrot.lane.b32.xlu1 %v4563_v45, %s4854_s29  ;;  %3246 = vrot.lane.b32.xlu0 %v4577_v53, %s4854_s29 }
 0x551   : > { %3338 = vrot.lane.b32.xlu0 %v4577_v53, %s4856_s27  ;;  %2703 = vrot.lane.b32.xlu1 %v4577_v53, %s4061_s26 }
 0x555   : > { %2705 = vrot.lane.b32.xlu0 %v4595_v60, %s4061_s26  ;;  %2796 = vrot.lane.b32.xlu1 %v4577_v53, %s4062_s0  ;;  %s4857_s26 = smov 111  }
 0x559   : > { %2798 = vrot.lane.b32.xlu0 %v4595_v60, %s4062_s0  ;;  %3060 = vrot.lane.b32.xlu1 %v4577_v53, %s4853_s23 }
 0x55d   : > { %3336 = vrot.lane.b32.xlu0 %v4563_v45, %s4856_s27  ;;  %2890 = vrot.lane.b32.xlu1 %v4595_v60, %s4063_s19 }
 0x561   : > { %3062 = vrot.lane.b32.xlu0 %v4595_v60, %s4853_s23  ;;  %3154 = vrot.lane.b32.xlu1 %v4595_v60, %s4855_s24 }
 0x565   : > { %3248 = vrot.lane.b32.xlu0 %v4595_v60, %s4854_s29  ;;  %3340 = vrot.lane.b32.xlu1 %v4595_v60, %s4856_s27 }
 0x569   : > { %3430 = vrot.lane.b32.xlu0 %v4577_v53, %s4857_s26  ;;  %3432 = vrot.lane.b32.xlu1 %v4595_v60, %s4857_s26 }
 0x56d   : > { %3426 = vrot.lane.b32.xlu0 %v4553_v42, %s4857_s26  ;;  %3428 = vrot.lane.b32.xlu1 %v4563_v45, %s4857_s26  ;;  %s4858_s26 = sshll.u32 %s4860_s22, 3 }
 0x56e   : > { %s521_s23 = scalar_lea.vmem %s4839_s16, %s4858_s26 }
 0x571   : > { %3541 = vrot.lane.b32.xlu0 %v4628_v62, %s4069_s17  ;;  %3531 = vperm.xlu1 %4049, %v3528_v63  }
 0x575   : > { %3689 = vrot.lane.b32.xlu1 %v4628_v62, %s4070_s28  ;;  %3766 = vrot.lane.b32.xlu0 %v4628_v62, %s4071_s30 }
 0x579   : > { %3851 = vperm.xlu1 %4049, %v3539_v1  }
 0x5a3   : > { %v2885_v5 = vpop.permute.xlu0 %2884  ;;  %v2700_v6 = vpop.permute.xlu1 %2699 }
 0x5a4   : > { %v2707_v44 = vsel %vm633_vm2, %v4249_v18, %v2700_v6 }
 0x5a7   : > { %v4641_v7 = vpop.permute.xlu0 %3242  ;;  %v2793_v9 = vpop.permute.xlu1 %2792 }
 0x5ab   : > { %v2702_v10 = vpop.permute.xlu0 %2701  ;;  %v4643_v11 = vpop.permute.xlu1 %3056 }
 0x5ac   : > { %v2708_v41 = vsel %vm633_vm2, %v2700_v6, %v2702_v10 }
 0x5af   : > { %v2795_v12 = vpop.permute.xlu0 %2794  ;;  %v4645_v14 = vpop.permute.xlu1 %3148 }
 0x5b0   : > { %v2801_v51 = vsel %vm720_vm3, %v2793_v9, %v2795_v12 }
 0x5b3   : > { %v4647_v13 = vpop.permute.xlu0 %3058  ;;  %v4649_v25 = vpop.permute.xlu1 %3334 }
 0x5b7   : > { %v2889_v26 = vpop.permute.xlu0 %2888  ;;  %v2887_v27 = vpop.permute.xlu1 %2886 }
 0x5b8   : > { %v2892_v63 = vsel %vm807_vm4, %v2885_v5, %v2887_v27 }
 0x5bb   : > { %v3153_v30 = vpop.permute.xlu0 %3152  ;;  %v4651_v31 = vpop.permute.xlu1 %3150 }
 0x5bc   : > { %v3157_v12 = vsel %vm1061_vm7, %v4651_v31, %v4255_v21 }
 0x5bf   : > { %v4653_v32 = vpop.permute.xlu0 %3246  ;;  %v4655_v33 = vpop.permute.xlu1 %3244 }
 0x5c3   : > { %v4657_v34 = vpop.permute.xlu0 %3338  ;;  %v2704_v35 = vpop.permute.xlu1 %2703 }
 0x5c4   : > { %v2709_v38 = vsel %vm633_vm2, %v4249_v18, %v2704_v35  ;;  %v2800_v18 = vsel %vm720_vm3, %v4245_v16, %v2793_v9 }
 0x5c7   : > { %v2706_v36 = vpop.permute.xlu0 %2705  ;;  %v2797_v28 = vpop.permute.xlu1 %2796 }
 0x5c8   : > { %v2710_v37 = vsel %vm633_vm2, %v2704_v35, %v2706_v36  ;;  %v2802_v50 = vsel %vm720_vm3, %v4245_v16, %v2797_v28  ;;  %v2893_v16 = vsel %vm807_vm4, %v2887_v27, %v4247_v17  ;;  %v3064_v27 = vsel %vm974_vm5, %v4251_v19, %v4643_v11  ;;  %v2693_v35 = vld [vmem:[%s4835_s12 + $0x1c] sm:$0xf] }
 0x5c9   : > { %3984 = vmatprep.subr.msk.mxu0 %vm537_vm0, %v2710_v37 }
 0x5ca   : > { %3985 = vmatpush1.msk.msra.mxu0 %vm537_vm0, %v2709_v38 }
 0x5cb   : > { %v2799_v46 = vpop.permute.xlu0 %2798  ;;  %2751 = vmatprep.subr.mxu0 %v2708_v41  ;;  %v3061_v47 = vpop.permute.xlu1 %3060 }
 0x5cc   : > { %v2803_v48 = vsel %vm720_vm3, %v2797_v28, %v2799_v46  ;;  %2752 = vmatpush1.msra.mxu0 %v2707_v44  ;;  %v3342_v28 = vsel %vm1237_vm8, %v4325_v57, %v4649_v25 }
 0x5cd   : > { %3987 = vmatprep.subr.msk.mxu0 %vm537_vm0, %v2803_v48  ;;  %3986 = vmatmul.mubr.msk.f32.vlgmr.msra.gmra.mxu0 %vm2713_vm11, %v2689_v29  ;;  %v2694_v29 = vld [vmem:[%s4835_s12 + $0x20] sm:$0xf] }
 0x5ce   : > { %3988 = vmatpush1.msk.msra.mxu0 %vm537_vm0, %v2802_v50  ;;  %2877 = vmatprep.mubr.f32.mxu0 %v4059_v0 }
 0x5cf   : > { %v3337_v52 = vpop.permute.xlu0 %3336  ;;  %2843 = vmatprep.subr.mxu0 %v2801_v51  ;;  %v2891_v54 = vpop.permute.xlu1 %2890 }
 0x5d0   : > { %v2894_v56 = vsel %vm807_vm4, %v2889_v26, %v2891_v54  ;;  %v2895_v58 = vsel %vm807_vm4, %v2891_v54, %v4247_v17  ;;  %2844 = vmatpush1.msra.mxu0 %v2800_v18  ;;  %v2690_v17 = vld [vmem:[%s4835_s12 + $0x10] sm:$0xf]  ;;  %v2687_v26 = vld [vmem:[%s4835_s12 + $0x4] sm:$0xf] }
 0x5d1   : > { %3990 = vmatprep.subr.msk.mxu1 %vm537_vm0, %v2895_v58  ;;  %3993 = vmatprep.subr.msk.mxu0 %vm537_vm0, %v4595_v60 }
 0x5d2   : > { %3989 = vmatmul.mubr.msk.f32.vlgmr.msra.gmra.mxu0 %vm2713_vm11, %v2686_v55  ;;  %3991 = vmatpush1.msk.msra.mxu1 %vm537_vm0, %v2894_v56 }
 0x5d3   : > { %3994 = vmatpush1.msk.msra.mxu0 %vm537_vm0, %v4577_v53  ;;  %v3063_v1 = vpop.permute.xlu0 %3062  ;;  %2935 = vmatprep.subr.mxu1 %v2893_v16  ;;  %v3155_v6 = vpop.permute.xlu1 %3154 }
 0x5d4   : > { %v3067_v60 = vsel %vm974_vm5, %v3061_v47, %v3063_v1  ;;  %3015 = vmatprep.subr.mxu0 %v4563_v45  ;;  %v3159_v9 = vsel %vm1061_vm7, %v3155_v6, %v4255_v21  ;;  %2936 = vmatpush1.msra.mxu1 %v2892_v63  ;;  %v3158_v5 = vsel %vm1061_vm7, %v3153_v30, %v3155_v6 }
 0x5d5   : > { %3016 = vmatpush1.msra.mxu0 %v4553_v42  ;;  %3992 = vmatmul.mubr.msk.f32.vlgmr.msra.gmra.mxu1 %vm2713_vm11, %v2692_v59  ;;  %v3066_v45 = vsel %vm974_vm5, %v4251_v19, %v3061_v47  ;;  %v3065_v42 = vsel %vm974_vm5, %v4643_v11, %v4647_v13  ;;  %v3156_v13 = vsel %vm1061_vm7, %v4645_v14, %v4651_v31 }
 0x5d6   : > { %3049 = vmatprep.mubr.f32.mxu0 %v4059_v0  ;;  %3996 = vmatprep.subr.msk.mxu1 %vm537_vm0, %v3067_v60  ;;  %v3344_v14 = vsel %vm1237_vm8, %v4325_v57, %v4657_v34  ;;  %v3251_v31 = vsel %vm1150_vm6, %v4655_v33, %v4253_v20  ;;  %v2688_v57 = vld [vmem:[%s4835_s12 + $0x8] sm:$0xf] }
 0x5d7   : > { %3999 = vmatprep.subr.msk.mxu0 %vm537_vm0, %v3159_v9  ;;  %3995 = vmatmul.mubr.msk.f32.vlgmr.msra.gmra.mxu0 %vm2713_vm11, %v2690_v17  ;;  %v3249_v53 = vpop.permute.xlu0 %3248  ;;  %v3341_v10 = vpop.permute.xlu1 %3340 }
 0x5d8   : > { %3997 = vmatpush1.msk.msra.mxu1 %vm537_vm0, %v3066_v45  ;;  %4000 = vmatpush1.msk.msra.mxu0 %vm537_vm0, %v3158_v5  ;;  %v3253_v30 = vsel %vm1150_vm6, %v3249_v53, %v4253_v20  ;;  %v3345_v21 = vsel %vm1237_vm8, %v4657_v34, %v3341_v10  ;;  %v3252_v19 = vsel %vm1150_vm6, %v4653_v32, %v3249_v53  ;;  %v2691_v20 = vld [vmem:[%s4835_s12 + $0x14] sm:$0xf] }
 0x5d9   : > { %3107 = vmatprep.subr.mxu1 %v3065_v42  ;;  %3199 = vmatprep.subr.mxu0 %v3157_v12  ;;  %v3343_v32 = vsel %vm1237_vm8, %v4649_v25, %v3337_v52  ;;  %v3250_v34 = vsel %vm1150_vm6, %v4641_v7, %v4655_v33 }
 0x5da   : > { %3108 = vmatpush1.msra.mxu1 %v3064_v27  ;;  %3141 = vmatprep.mubr.f32.mxu1 %v4059_v0 }
 0x5db   : > { %3200 = vmatpush1.msra.mxu0 %v3156_v13  ;;  %3998 = vmatmul.mubr.msk.f32.vlgmr.msra.gmra.mxu1 %vm2713_vm11, %v2687_v26  ;;  %v3431_v11 = vpop.permute.xlu0 %3430  ;;  %v3433_v36 = vpop.permute.xlu1 %3432 }
 0x5dc   : > { %3233 = vmatprep.mubr.f32.mxu0 %v4059_v0  ;;  %4002 = vmatprep.subr.msk.mxu1 %vm537_vm0, %v3253_v30  ;;  %v3437_v37 = vsel %vm1324_vm9, %v3433_v36, %v4339_v61  ;;  %v3436_v25 = vsel %vm1324_vm9, %v3431_v11, %v3433_v36 }
 0x5dd   : > { %4005 = vmatprep.subr.msk.mxu0 %vm537_vm0, %v3345_v21  ;;  %4001 = vmatmul.mubr.msk.f32.vlgmr.msra.gmra.mxu0 %vm2713_vm11, %v2693_v35 }
 0x5de   : > { %4003 = vmatpush1.msk.msra.mxu1 %vm537_vm0, %v3252_v19  ;;  %4006 = vmatpush1.msk.msra.mxu0 %vm537_vm0, %v3344_v14 }
 0x5df   : > { %3293 = vmatprep.subr.mxu1 %v3251_v31  ;;  %3385 = vmatprep.subr.mxu0 %v3343_v32  ;;  %v3427_v38 = vpop.permute.xlu0 %3426  ;;  %v3429_v41 = vpop.permute.xlu1 %3428 }
 0x5e0   : > { %3294 = vmatpush1.msra.mxu1 %v3250_v34  ;;  %3386 = vmatpush1.msra.mxu0 %v3342_v28  ;;  %v3435_v7 = vsel %vm1324_vm9, %v3429_v41, %v4339_v61  ;;  %v3434_v33 = vsel %vm1324_vm9, %v3427_v38, %v3429_v41 }
 0x5e1   : > { %3327 = vmatprep.mubr.f32.mxu1 %v4059_v0  ;;  %3419 = vmatprep.mubr.f32.mxu0 %v4059_v0 }
 0x5e2   : > { %4008 = vmatprep.subr.msk.mxu1 %vm537_vm0, %v3437_v37  ;;  %4011 = vmatprep.subr.msk.mxu0 %vm537_vm0, %v4382_v3 }
 0x5e3   : > { %4004 = vmatmul.mubr.msk.f32.vlgmr.msra.gmra.mxu1 %vm2713_vm11, %v2691_v20  ;;  %4007 = vmatmul.mubr.msk.f32.vlgmr.msra.gmra.mxu0 %vm2713_vm11, %v2688_v57  ;;  %v3542_v61 = vpop.permute.xlu0 %3541 }
 0x5e4   : > { %4009 = vmatpush1.msk.msra.mxu1 %vm537_vm0, %v3436_v25  ;;  %4012 = vmatpush1.msk.msra.mxu0 %vm537_vm0, %v4384_v8 }
 0x5e5   : > { %4017 = vmatprep.subr.msk.mxu0 %vm537_vm0, %v2400_v23  ;;  %3477 = vmatprep.subr.mxu1 %v3435_v7 }
 0x5e6   : > { %3478 = vmatpush1.msra.mxu1 %v3434_v33  ;;  %3511 = vmatprep.mubr.f32.mxu1 %v4059_v0 }
 0x5e7   : > { %4010 = vmatmul.mubr.msk.f32.vlgmr.msra.gmra.mxu1 %vm2713_vm11, %v2694_v29  ;;  %3609 = vmatprep.mubr.f32.mxu0 %v4059_v0 }
 0x5e8   : > { %4013 = vmatmul.mubr.msk.f32.vlgmr.msra.gmra.mxu0 %vm533_vm1, %v3542_v61  ;;  %4014 = vmatprep.subr.msk.mxu1 %vm537_vm0, %v4358_v4 }
 0x5e9   : > { %4018 = vmatpush1.msk.msra.mxu0 %vm537_vm0, %v2399_v24  ;;  %4015 = vmatpush1.msk.msra.mxu1 %vm537_vm0, %v4354_v2 }
 0x5ea   : > { %3682 = vmatprep.mubr.f32.mxu1 %v4059_v0  ;;  %3757 = vmatprep.mubr.f32.mxu0 %v4059_v0 }
 0x5eb   : > { %4016 = vmatmul.mubr.msk.f32.vlgmr.msra.gmra.mxu1 %vm533_vm1, %v4628_v62 }
 0x5ec   : > { %v3532_v3 = vpop.permute.xlu1 %3531  ;;  %3840 = vmatprep.mubr.f32.mxu1 %v4059_v0 }
 0x5f0   : > { %v3690_v8 = vpop.permute.xlu1 %3689 }
 0x5f1   : > { %4019 = vmatmul.mubr.msk.f32.vlgmr.msra.gmra.mxu0 %vm533_vm1, %v3690_v8 }
 0x5f4   : > { %v3852_v20 = vpop.permute.xlu1 %3851 }
 0x68d   : > { %v2787_v4 = vpop.f32.mrf.mxu0 }
 0x68f   : > { %v2789_v15 = vpop.f32.mrf.mxu0 }
 0x692   : > { %v2879_v22 = vpop.f32.mrf.mxu0 }
 0x693   : > { %v2880_v18 = vadd.f32 %v2879_v22, %v2787_v4 }
 0x694   : > { %v2881_v23 = vpop.f32.mrf.mxu0 }
 0x695   : > { %v2971_v24 = vpop.f32.mrf.mxu1  ;;  %v2882_v0 = vadd.f32 %v2881_v23, %v2789_v15 }
 0x696   : > { %v2976_v55 = vadd.f32 %v2971_v24, %v2880_v18 }
 0x697   : > { %v2973_v44 = vpop.f32.mrf.mxu1  ;;  %v3051_v2 = vpop.f32.mrf.mxu0 }
 0x698   : > { %v2977_v59 = vadd.f32 %v2973_v44, %v2882_v0  ;;  %v3520_v60 = vmul.f32 %v2976_v55, %v4370_v39  ;;  %v3767_v39 = vpop.permute.xlu0 %3766 }
 0x699   : > { %v3053_v46 = vpop.f32.mrf.mxu0 }
 0x69a   : > { %v3521_v53 = vmul.f32 %v2977_v59, %v4372_v40 }
 0x69b   : > { %v3143_v47 = vpop.f32.mrf.mxu1 }
 0x69c   : > { %v3144_v62 = vadd.f32 %v3143_v47, %v3051_v2 }
 0x69d   : > { %v3235_v48 = vpop.f32.mrf.mxu0  ;;  %v3145_v50 = vpop.f32.mrf.mxu1 }
 0x69e   : > { %v3146_v56 = vadd.f32 %v3145_v50, %v3053_v46  ;;  %v3240_v63 = vadd.f32 %v3235_v48, %v3144_v62 }
 0x69f   : > { %v3237_v51 = vpop.f32.mrf.mxu0 }
 0x6a0   : > { %v3241_v9 = vadd.f32 %v3237_v51, %v3146_v56  ;;  %v3522_v10 = vadd.f32 %v3520_v60, %v3240_v63 }
 0x6a2   : > { %v3523_v26 = vadd.f32 %v3521_v53, %v3241_v9 }
 0x6a3   : > { %v3329_v52 = vpop.f32.mrf.mxu1  ;;  %v3421_v54 = vpop.f32.mrf.mxu0 }
 0x6a4   : > { %v3422_v1 = vadd.f32 %v3421_v54, %v3329_v52 }
 0x6a5   : > { %v3331_v58 = vpop.f32.mrf.mxu1  ;;  %v3423_v16 = vpop.f32.mrf.mxu0 }
 0x6a6   : > { %v3424_v17 = vadd.f32 %v3423_v16, %v3331_v58 }
 0x6a7   : > { %v3513_v6 = vpop.f32.mrf.mxu1 }
 0x6a8   : > { %v3518_v5 = vadd.f32 %v3513_v6, %v3422_v1  ;;  %v3611_v40 = vpop.f32.mrf.mxu0 }
 0x6a9   : > { %v3515_v45 = vpop.f32.mrf.mxu1 }
 0x6aa   : > { %v3524_v42 = vmul.f32 %v3518_v5, %v4374_v43  ;;  %v3519_v12 = vadd.f32 %v3515_v45, %v3424_v17  ;;  %v3613_v36 = vpop.f32.mrf.mxu0 }
 0x6ab   : > { %v3684_v43 = vpop.f32.mrf.mxu1 }
 0x6ac   : > { %v3526_v27 = vadd.f32 %v3524_v42, %v3522_v10  ;;  %v3525_v30 = vmul.f32 %v3519_v12, %v4376_v49  ;;  %v3685_v32 = vadd.f32 %v3684_v43, %v3611_v40 }
 0x6ad   : > { %v3686_v14 = vpop.f32.mrf.mxu1 }
 0x6ae   : > { %v3527_v13 = vadd.f32 %v3525_v30, %v3523_v26  ;;  %v3534_v21 = vadd.f32 %v3532_v3, %v3526_v27  ;;  %v3687_v49 = vadd.f32 %v3686_v14, %v3613_v36 }
 0x6b0   : > { %v3535_v35 = vadd.f32 %v3532_v3, %v3527_v13  ;;  %v3536_v11 = vmax.f32 %v3534_v21, 0.0 }
 0x6b1   : > { %v3759_v31 = vpop.f32.mrf.mxu0 }
 0x6b2   : > { %v3537_v19 = vmax.f32 %v3535_v35, 0.0  ;;  %v3764_v34 = vadd.f32 %v3759_v31, %v3685_v32 }
 0x6b3   : > { %v3761_v28 = vpop.f32.mrf.mxu0 }
 0x6b4   : > { %4020 = vmatprep.subr.msk.mxu1 %vm537_vm0, %v3537_v19  ;;  %v3765_v38 = vadd.f32 %v3761_v28, %v3687_v49 }
 0x6b5   : > { %4021 = vmatpush1.msk.msra.mxu1 %vm537_vm0, %v3536_v11 }
 0x6b6   : > { %4022 = vmatmul.mubr.msk.f32.vlgmr.msra.gmra.mxu1 %vm533_vm1, %v3767_v39 }
 0x776   : > { %v3842_v37 = vpop.f32.mrf.mxu1 }
 0x777   : > { %v3847_v41 = vadd.f32 %v3842_v37, %v3764_v34 }
 0x778   : > { %v3844_v57 = vpop.f32.mrf.mxu1 }
 0x779   : > { %v3854_v25 = vadd.f32 %v3852_v20, %v3847_v41  ;;  %v3848_v7 = vadd.f32 %v3844_v57, %v3765_v38 }
 0x77b   : > { %v3855_v33 = vadd.f32 %v3852_v20, %v3848_v7  ;;  %v3856_v29 = vmax.f32 %v3854_v25, 0.0 }
 0x77d   : > { %v3857_v61 = vmax.f32 %v3855_v33, 0.0 }
 0x77f   : > { %v3860_v3 = vcombine.low %v3856_v29, %v3857_v61 }
 0x781   : > { %3862 = vst [vmem:[%s521_s23] sm:$0xff] %v3860_v3 }
 0x782 PF: > { %s26_s21 = sadd.s32 1, %s4057_s21  }
 0x783   : > { %p23_p4 = scmp.ge.s32.totalorder %s26_s21, 4  }
 0x785   :  { %25 = sbr.rel (!%p23_p4) target bundleno = 2 (0x2), region = 114 }

</bundles_post_ra>
